<compile_context>
chip_gen: v7x
topology: tpu7x:2x2x1
jax: 0.10.0
libtpu: 0.0.40
codegen_flags: <defaults>
</compile_context>

<pallas_src>
import jax
import jax.numpy as jnp
from jax import lax
from jax.experimental import pallas as pl
from jax.experimental.pallas import tpu as pltpu

# ---- small but structure-preserving hyperparameters ------------------------
SEQ_LEN   = 32          # original: 96
PRED_LEN  = 16          # original: 336
ENC_IN    = 4           # original: 7
SEG_LEN   = 8           # original: 24
D_MODEL   = 128         # original: 512
BATCH     = 4           # original: 32
SEG_NUM_X = SEQ_LEN // SEG_LEN     # 4
SEG_NUM_Y = PRED_LEN // SEG_LEN    # 2
N_ROWS    = BATCH * ENC_IN         # GRU "batch" (rows) for encoder/decoder

# Split the independent row dimension across a parallel grid axis (2 blocks
# when rows allow an (8,128)-aligned split; v7x runs one block per TensorCore).
NUM_ROW_BLOCKS = 2 if (N_ROWS % 16 == 0) else 1
ROW_BLK = N_ROWS // NUM_ROW_BLOCKS


def segrnn_kernel(x_seg_ref, w_emb_ref, b_emb_ref,
                  w_ih_ref, w_hh_ref, b_ih_ref, b_hh_ref,
                  pos_ref, ch_ref, w_pred_ref, b_pred_ref,
                  out_ref, gi_scr):
    D = D_MODEL
    H = D // 2
    R = ROW_BLK
    Y = SEG_NUM_Y

    # bf16 weights (pre-cast once in prepare_params); biases stay f32.
    w_emb  = w_emb_ref[...]
    w_ih   = w_ih_ref[...]
    w_hh   = w_hh_ref[...]
    w_pred = w_pred_ref[...]
    b_emb  = b_emb_ref[...]
    b_ih   = b_ih_ref[...]
    b_hh   = b_hh_ref[...]
    b_pred = b_pred_ref[...]

    def gates(gi, gh, h):
        # PyTorch GRU, gate order [r | z | n]; elementwise math kept in f32
        # (v5e has no bf16 VPU/EUP).
        r = jax.nn.sigmoid(gi[..., 0:D]     + gh[..., 0:D])
        z = jax.nn.sigmoid(gi[..., D:2 * D] + gh[..., D:2 * D])
        n = jnp.tanh(gi[..., 2 * D:3 * D] + r * gh[..., 2 * D:3 * D])
        return (1.0 - z) * n + z * h

    # ---------------- encoder ----------------
    # value embedding for every encoder segment in ONE matmul: (X*R, L)@(L, D)
    x_seg = x_seg_ref[...].reshape(SEG_NUM_X * R, SEG_LEN)
    emb = jnp.maximum(
        jnp.dot(x_seg.astype(jnp.bfloat16), w_emb,
                preferred_element_type=jnp.float32) + b_emb, 0.0)

    # input-side GRU matmul hoisted out of the recurrence: (X*R, 3D) at once,
    # stashed in VMEM scratch so the serial loop slices a ref (bounds live
    # ranges instead of keeping the whole slab live in vregs).
    gi_scr[...] = jnp.dot(emb.astype(jnp.bfloat16), w_ih,
                          preferred_element_type=jnp.float32) + b_ih

    def enc_step(t, h):
        gh = jnp.dot(h.astype(jnp.bfloat16), w_hh,
                     preferred_element_type=jnp.float32) + b_hh
        start = pl.multiple_of(t * R, 8)
        gi = gi_scr[pl.ds(start, R), :]
        return gates(gi, gh, h)

    h = lax.fori_loop(0, SEG_NUM_X, enc_step,
                      jnp.zeros((R, D), jnp.float32), unroll=True)

    # ---------------- decoder (batched over all Y predicted segments) -------
    # x_dec row (b, c, y) = concat(pos_emb[y], channel_emb[c]); never built.
    # Its input-gate contribution splits over the two halves of w_ih:
    #   gi[(b,c,y)] = pos_emb[y] @ w_ih[:H] + channel_emb[c] @ w_ih[H:] + b_ih
    gp = jnp.dot(pos_ref[...], w_ih[:H, :],
                 preferred_element_type=jnp.float32)                  # (Y, 3D)
    gc = jnp.dot(ch_ref[...], w_ih[H:, :],
                 preferred_element_type=jnp.float32) + b_ih           # (R, 3D)

    # every decoder step shares the encoder final state h -> one w_hh matmul.
    gh_dec = jnp.dot(h.astype(jnp.bfloat16), w_hh,
                     preferred_element_type=jnp.float32) + b_hh       # (R, 3D)

    # gi for ALL predicted segments at once, one gates() pass, one head matmul.
    gi_dec = (jnp.broadcast_to(gp[:, None, :], (Y, R, 3 * D)) +
              jnp.broadcast_to(gc[None, :, :], (Y, R, 3 * D)))        # (Y,R,3D)
    gh_b = jnp.broadcast_to(gh_dec[None, :, :], (Y, R, 3 * D))
    h_b  = jnp.broadcast_to(h[None, :, :], (Y, R, D))
    hy = gates(gi_dec, gh_b, h_b)                                     # (Y, R, D)

    # prediction head (Dropout is identity in eval mode): single MXU matmul.
    yhat = jnp.dot(hy.reshape(Y * R, D).astype(jnp.bfloat16), w_pred,
                   preferred_element_type=jnp.float32) + b_pred       # (Y*R, S)
    out_ref[...] = yhat.reshape(Y, R, SEG_LEN)


def init_params(key):
    ks = jax.random.split(key, 10)
    s = 0.1
    return dict(
        w_emb=jax.random.normal(ks[0], (SEG_LEN, D_MODEL), jnp.float32) * s,
        b_emb=jax.random.normal(ks[1], (1, D_MODEL), jnp.float32) * s,
        # GRU weights pre-transposed to (in, 3*hidden), gate order [r | z | n]
        w_ih=jax.random.normal(ks[2], (D_MODEL, 3 * D_MODEL), jnp.float32) * s,
        w_hh=jax.random.normal(ks[3], (D_MODEL, 3 * D_MODEL), jnp.float32) * s,
        b_ih=jax.random.normal(ks[4], (1, 3 * D_MODEL), jnp.float32) * s,
        b_hh=jax.random.normal(ks[5], (1, 3 * D_MODEL), jnp.float32) * s,
        pos_emb=jax.random.normal(ks[6], (SEG_NUM_Y, D_MODEL // 2), jnp.float32),
        channel_emb=jax.random.normal(ks[7], (ENC_IN, D_MODEL // 2), jnp.float32),
        w_pred=jax.random.normal(ks[8], (D_MODEL, SEG_LEN), jnp.float32) * s,
        b_pred=jax.random.normal(ks[9], (1, SEG_LEN), jnp.float32) * s,
    )


def prepare_params(p):
    """One-time prep (outside the per-call path): bf16 weight casts and the
    batch-expanded channel table.  Biases stay f32."""
    bf16 = jnp.bfloat16
    return dict(
        w_emb=p["w_emb"].astype(bf16), b_emb=p["b_emb"],
        w_ih=p["w_ih"].astype(bf16), w_hh=p["w_hh"].astype(bf16),
        b_ih=p["b_ih"], b_hh=p["b_hh"],
        pos_emb=p["pos_emb"].astype(bf16),
        # tiny batch-expanded channel table: row (b, c) -> channel_emb[c]
        ch_full=jnp.tile(p["channel_emb"], (BATCH, 1)).astype(bf16),
        w_pred=p["w_pred"].astype(bf16), b_pred=p["b_pred"],
    )


@jax.jit
def segrnn_forward(x, p):
    seq_last = x[:, -1:, :]                               # (B, 1, C)
    xc = (x - seq_last).transpose(0, 2, 1)                # (B, C, L)
    # time-major encoder segments: (X, N_ROWS, S), rows ordered (b, c)
    x_seg = (xc.reshape(N_ROWS, SEG_NUM_X, SEG_LEN)
               .transpose(1, 0, 2))

    D = D_MODEL
    in_specs = [
        pl.BlockSpec((SEG_NUM_X, ROW_BLK, SEG_LEN), lambda r: (0, r, 0)),  # x_seg
        pl.BlockSpec((SEG_LEN, D), lambda r: (0, 0)),                      # w_emb
        pl.BlockSpec((1, D), lambda r: (0, 0)),                            # b_emb
        pl.BlockSpec((D, 3 * D), lambda r: (0, 0)),                        # w_ih
        pl.BlockSpec((D, 3 * D), lambda r: (0, 0)),                        # w_hh
        pl.BlockSpec((1, 3 * D), lambda r: (0, 0)),                        # b_ih
        pl.BlockSpec((1, 3 * D), lambda r: (0, 0)),                        # b_hh
        pl.BlockSpec((SEG_NUM_Y, D // 2), lambda r: (0, 0)),               # pos_emb
        pl.BlockSpec((ROW_BLK, D // 2), lambda r: (r, 0)),                 # ch_full
        pl.BlockSpec((D, SEG_LEN), lambda r: (0, 0)),                      # w_pred
        pl.BlockSpec((1, SEG_LEN), lambda r: (0, 0)),                      # b_pred
    ]
    out_specs = pl.BlockSpec((SEG_NUM_Y, ROW_BLK, SEG_LEN), lambda r: (0, r, 0))

    y_flat = pl.pallas_call(
        segrnn_kernel,
        out_shape=jax.ShapeDtypeStruct((SEG_NUM_Y, N_ROWS, SEG_LEN), jnp.float32),
        grid=(NUM_ROW_BLOCKS,),
        in_specs=in_specs,
        out_specs=out_specs,
        scratch_shapes=[pltpu.VMEM((SEG_NUM_X * ROW_BLK, 3 * D), jnp.float32)],
        compiler_params=pltpu.CompilerParams(
            dimension_semantics=("parallel",),
            vmem_limit_bytes=48 * 1024 * 1024),
    )(x_seg,
      p["w_emb"], p["b_emb"],
      p["w_ih"], p["w_hh"], p["b_ih"], p["b_hh"],
      p["pos_emb"], p["ch_full"],
      p["w_pred"], p["b_pred"])

    # (Y, N, S) -> rows (b, c), lanes (y, seg) -> (B, pred_len, C), de-normalize
    y = (y_flat.transpose(1, 0, 2)
               .reshape(BATCH, ENC_IN, PRED_LEN)
               .transpose(0, 2, 1)) + seq_last
    return y


def segrnn_reference(x, p):
    """Pure-JAX (f32) mirror of the PyTorch forward (dropout = identity)."""
    D = D_MODEL
    seq_last = x[:, -1:, :]
    xc = (x - seq_last).transpose(0, 2, 1).reshape(-1, SEG_NUM_X, SEG_LEN)
    emb = jax.nn.relu(xc @ p["w_emb"] + p["b_emb"])       # (N, X, D)

    def cell(h, x_t):
        gi = x_t @ p["w_ih"] + p["b_ih"]
        gh = h @ p["w_hh"] + p["b_hh"]
        r = jax.nn.sigmoid(gi[:, :D] + gh[:, :D])
        z = jax.nn.sigmoid(gi[:, D:2 * D] + gh[:, D:2 * D])
        n = jnp.tanh(gi[:, 2 * D:] + r * gh[:, 2 * D:])
        return (1.0 - z) * n + z * h, None

    h0 = jnp.zeros((N_ROWS, D), jnp.float32)
    hn, _ = jax.lax.scan(cell, h0, jnp.transpose(emb, (1, 0, 2)))

    pce = jnp.concatenate([
        jnp.broadcast_to(p["pos_emb"][None], (ENC_IN, SEG_NUM_Y, D // 2)),
        jnp.broadcast_to(p["channel_emb"][:, None], (ENC_IN, SEG_NUM_Y, D // 2)),
    ], axis=-1)                                           # (C, Y, D)
    x_dec = jnp.tile(pce.reshape(ENC_IN * SEG_NUM_Y, D), (BATCH, 1))  # (b,c,y)
    h0d = jnp.repeat(hn, SEG_NUM_Y, axis=0)                           # (b,c,y)
    hy, _ = cell(h0d, x_dec)
    yy = hy @ p["w_pred"] + p["b_pred"]
    return yy.reshape(BATCH, ENC_IN, PRED_LEN).transpose(0, 2, 1) + seq_last


if __name__ == "__main__":
    key = jax.random.PRNGKey(0)
    kx, kp = jax.random.split(key)
    params = init_params(kp)
    kparams = prepare_params(params)
    x = jax.random.normal(kx, (BATCH, SEQ_LEN, ENC_IN), jnp.float32)

    y = jax.block_until_ready(segrnn_forward(x, kparams))
    y_ref = jax.block_until_ready(segrnn_reference(x, params))

    assert y.shape == (BATCH, PRED_LEN, ENC_IN)
    # bf16 matmul operands in the kernel vs. f32 reference -> relaxed tolerance
    assert jnp.allclose(y, y_ref, atol=5e-2, rtol=5e-2), (
        float(jnp.max(jnp.abs(y - y_ref))))
    print("KERNEL_OK")
</pallas_src>

<mosaic_0001>
module attributes {stable_mosaic.version = 11 : i64} {
  func.func @segrnn_kernel(%arg0: i32, %arg1: memref<4x8x8xf32, #tpu.memory_space<vmem>>, %arg2: memref<8x128xbf16, #tpu.memory_space<vmem>>, %arg3: memref<1x128xf32, #tpu.memory_space<vmem>>, %arg4: memref<128x384xbf16, #tpu.memory_space<vmem>>, %arg5: memref<128x384xbf16, #tpu.memory_space<vmem>>, %arg6: memref<1x384xf32, #tpu.memory_space<vmem>>, %arg7: memref<1x384xf32, #tpu.memory_space<vmem>>, %arg8: memref<2x64xbf16, #tpu.memory_space<vmem>>, %arg9: memref<8x64xbf16, #tpu.memory_space<vmem>>, %arg10: memref<128x8xbf16, #tpu.memory_space<vmem>>, %arg11: memref<1x8xf32, #tpu.memory_space<vmem>>, %arg12: memref<2x8x8xf32, #tpu.memory_space<vmem>>, %arg13: memref<32x384xf32, #tpu.memory_space<vmem>>) attributes {dimension_semantics = [#tpu.dimension_semantics<parallel>], iteration_bounds = array<i64: 2>, scalar_prefetch = 0 : i64, scratch_operands = 1 : i64, tpu.core_type = #tpu.core_type<tc>, window_params = [{transform_indices = @transform_0, window_bounds = array<i64: 4, 8, 8>}, {pipeline_mode = #tpu.pipeline_mode<synchronous>, transform_indices = @transform_1, window_bounds = array<i64: 8, 128>}, {pipeline_mode = #tpu.pipeline_mode<synchronous>, transform_indices = @transform_2, window_bounds = array<i64: 1, 128>}, {pipeline_mode = #tpu.pipeline_mode<synchronous>, transform_indices = @transform_3, window_bounds = array<i64: 128, 384>}, {pipeline_mode = #tpu.pipeline_mode<synchronous>, transform_indices = @transform_4, window_bounds = array<i64: 128, 384>}, {pipeline_mode = #tpu.pipeline_mode<synchronous>, transform_indices = @transform_5, window_bounds = array<i64: 1, 384>}, {pipeline_mode = #tpu.pipeline_mode<synchronous>, transform_indices = @transform_6, window_bounds = array<i64: 1, 384>}, {pipeline_mode = #tpu.pipeline_mode<synchronous>, transform_indices = @transform_7, window_bounds = array<i64: 2, 64>}, {transform_indices = @transform_8, window_bounds = array<i64: 8, 64>}, {pipeline_mode = #tpu.pipeline_mode<synchronous>, transform_indices = @transform_9, window_bounds = array<i64: 128, 8>}, {pipeline_mode = #tpu.pipeline_mode<synchronous>, transform_indices = @transform_10, window_bounds = array<i64: 1, 8>}, {transform_indices = @transform_11, window_bounds = array<i64: 2, 8, 8>}]} {
    %c0 = arith.constant 0 : index
    %c0_0 = arith.constant 0 : index
    %0 = vector.load %arg2[%c0, %c0_0] : memref<8x128xbf16, #tpu.memory_space<vmem>>, vector<8x128xbf16>
    %c0_1 = arith.constant 0 : index
    %c0_2 = arith.constant 0 : index
    %1 = vector.load %arg4[%c0_1, %c0_2] : memref<128x384xbf16, #tpu.memory_space<vmem>>, vector<128x384xbf16>
    %c0_3 = arith.constant 0 : index
    %c0_4 = arith.constant 0 : index
    %2 = vector.load %arg5[%c0_3, %c0_4] : memref<128x384xbf16, #tpu.memory_space<vmem>>, vector<128x384xbf16>
    %c0_5 = arith.constant 0 : index
    %c0_6 = arith.constant 0 : index
    %3 = vector.load %arg10[%c0_5, %c0_6] : memref<128x8xbf16, #tpu.memory_space<vmem>>, vector<128x8xbf16>
    %c0_7 = arith.constant 0 : index
    %c0_8 = arith.constant 0 : index
    %4 = vector.load %arg3[%c0_7, %c0_8] : memref<1x128xf32, #tpu.memory_space<vmem>>, vector<1x128xf32>
    %c0_9 = arith.constant 0 : index
    %c0_10 = arith.constant 0 : index
    %5 = vector.load %arg6[%c0_9, %c0_10] : memref<1x384xf32, #tpu.memory_space<vmem>>, vector<1x384xf32>
    %c0_11 = arith.constant 0 : index
    %c0_12 = arith.constant 0 : index
    %6 = vector.load %arg7[%c0_11, %c0_12] : memref<1x384xf32, #tpu.memory_space<vmem>>, vector<1x384xf32>
    %c0_13 = arith.constant 0 : index
    %c0_14 = arith.constant 0 : index
    %7 = vector.load %arg11[%c0_13, %c0_14] : memref<1x8xf32, #tpu.memory_space<vmem>>, vector<1x8xf32>
    %c0_15 = arith.constant 0 : index
    %c0_16 = arith.constant 0 : index
    %c0_17 = arith.constant 0 : index
    %8 = vector.load %arg1[%c0_15, %c0_16, %c0_17] : memref<4x8x8xf32, #tpu.memory_space<vmem>>, vector<4x8x8xf32>
    %9 = vector.shape_cast %8 : vector<4x8x8xf32> to vector<32x8xf32>
    %10 = arith.truncf %9 : vector<32x8xf32> to vector<32x8xbf16>
    %cst = arith.constant dense<0.000000e+00> : vector<32x128xf32>
    %11 = tpu.matmul %10, %0, %cst {dimension_numbers = #tpu.dot_dimension_numbers<[1], [0], [0], [1], [0, 0, 1, 1], [], []>} : vector<32x8xbf16>, vector<8x128xbf16>, vector<32x128xf32> -> vector<32x128xf32>
    %12 = vector.broadcast %4 : vector<1x128xf32> to vector<32x128xf32>
    %13 = arith.addf %11, %12 : vector<32x128xf32>
    %cst_18 = arith.constant 0.000000e+00 : f32
    %14 = vector.broadcast %cst_18 : f32 to vector<32x128xf32>
    %15 = arith.maximumf %13, %14 : vector<32x128xf32>
    %16 = arith.truncf %15 : vector<32x128xf32> to vector<32x128xbf16>
    %cst_19 = arith.constant dense<0.000000e+00> : vector<32x384xf32>
    %17 = tpu.matmul %16, %1, %cst_19 {dimension_numbers = #tpu.dot_dimension_numbers<[1], [0], [0], [1], [0, 0, 1, 1], [], []>} : vector<32x128xbf16>, vector<128x384xbf16>, vector<32x384xf32> -> vector<32x384xf32>
    %18 = vector.broadcast %5 : vector<1x384xf32> to vector<32x384xf32>
    %19 = arith.addf %17, %18 : vector<32x384xf32>
    %c0_20 = arith.constant 0 : index
    %c0_21 = arith.constant 0 : index
    %20 = vector.load %arg13[%c0_20, %c0_21] : memref<32x384xf32, #tpu.memory_space<vmem>>, vector<32x384xf32>
    tpu.vector_store %arg13[%c0_20, %c0_21], %19 {strides = array<i32>} : memref<32x384xf32, #tpu.memory_space<vmem>>, vector<32x384xf32>,
    %cst_22 = arith.constant 0.000000e+00 : f32
    %21 = vector.broadcast %cst_22 : f32 to vector<8x128xf32>
    %c0_i32 = arith.constant 0 : i32
    %22 = arith.truncf %21 : vector<8x128xf32> to vector<8x128xbf16>
    %cst_23 = arith.constant dense<0.000000e+00> : vector<8x384xf32>
    %23 = tpu.matmul %22, %2, %cst_23 {dimension_numbers = #tpu.dot_dimension_numbers<[1], [0], [0], [1], [0, 0, 1, 1], [], []>} : vector<8x128xbf16>, vector<128x384xbf16>, vector<8x384xf32> -> vector<8x384xf32>
    %24 = vector.broadcast %6 : vector<1x384xf32> to vector<8x384xf32>
    %25 = arith.addf %23, %24 : vector<8x384xf32>
    %c8_i32 = arith.constant 8 : i32
    %26 = arith.muli %c0_i32, %c8_i32 : i32
    %27 = tpu.assume_multiple %26, 8 : i32
    %28 = arith.index_cast %27 : i32 to index
    %c0_24 = arith.constant 0 : index
    %29 = vector.load %arg13[%28, %c0_24] : memref<32x384xf32, #tpu.memory_space<vmem>>, vector<8x384xf32>
    %30 = vector.extract_strided_slice %29 {offsets = [0, 0], sizes = [8, 128], strides = [1, 1]} : vector<8x384xf32> to vector<8x128xf32>
    %31 = vector.extract_strided_slice %25 {offsets = [0, 0], sizes = [8, 128], strides = [1, 1]} : vector<8x384xf32> to vector<8x128xf32>
    %32 = arith.addf %30, %31 : vector<8x128xf32>
    %33 = arith.negf %32 : vector<8x128xf32>
    %34 = math.exp %33 : vector<8x128xf32>
    %cst_25 = arith.constant 1.000000e+00 : f32
    %35 = vector.broadcast %cst_25 : f32 to vector<8x128xf32>
    %36 = arith.addf %35, %34 : vector<8x128xf32>
    %37 = arith.divf %35, %36 : vector<8x128xf32>
    %38 = vector.extract_strided_slice %29 {offsets = [0, 128], sizes = [8, 128], strides = [1, 1]} : vector<8x384xf32> to vector<8x128xf32>
    %39 = vector.extract_strided_slice %25 {offsets = [0, 128], sizes = [8, 128], strides = [1, 1]} : vector<8x384xf32> to vector<8x128xf32>
    %40 = arith.addf %38, %39 : vector<8x128xf32>
    %41 = arith.negf %40 : vector<8x128xf32>
    %42 = math.exp %41 : vector<8x128xf32>
    %cst_26 = arith.constant 1.000000e+00 : f32
    %43 = vector.broadcast %cst_26 : f32 to vector<8x128xf32>
    %44 = arith.addf %43, %42 : vector<8x128xf32>
    %45 = arith.divf %43, %44 : vector<8x128xf32>
    %46 = vector.extract_strided_slice %29 {offsets = [0, 256], sizes = [8, 128], strides = [1, 1]} : vector<8x384xf32> to vector<8x128xf32>
    %47 = vector.extract_strided_slice %25 {offsets = [0, 256], sizes = [8, 128], strides = [1, 1]} : vector<8x384xf32> to vector<8x128xf32>
    %48 = arith.mulf %37, %47 : vector<8x128xf32>
    %49 = arith.addf %46, %48 : vector<8x128xf32>
    %50 = math.tanh %49 : vector<8x128xf32>
    %cst_27 = arith.constant 1.000000e+00 : f32
    %51 = vector.broadcast %cst_27 : f32 to vector<8x128xf32>
    %52 = arith.subf %51, %45 : vector<8x128xf32>
    %53 = arith.mulf %52, %50 : vector<8x128xf32>
    %54 = arith.mulf %45, %21 : vector<8x128xf32>
    %55 = arith.addf %53, %54 : vector<8x128xf32>
    %c1_i32 = arith.constant 1 : i32
    %56 = arith.truncf %55 : vector<8x128xf32> to vector<8x128xbf16>
    %cst_28 = arith.constant dense<0.000000e+00> : vector<8x384xf32>
    %57 = tpu.matmul %56, %2, %cst_28 {dimension_numbers = #tpu.dot_dimension_numbers<[1], [0], [0], [1], [0, 0, 1, 1], [], []>} : vector<8x128xbf16>, vector<128x384xbf16>, vector<8x384xf32> -> vector<8x384xf32>
    %58 = vector.broadcast %6 : vector<1x384xf32> to vector<8x384xf32>
    %59 = arith.addf %57, %58 : vector<8x384xf32>
    %c8_i32_29 = arith.constant 8 : i32
    %60 = arith.muli %c1_i32, %c8_i32_29 : i32
    %61 = tpu.assume_multiple %60, 8 : i32
    %62 = arith.index_cast %61 : i32 to index
    %c0_30 = arith.constant 0 : index
    %63 = vector.load %arg13[%62, %c0_30] : memref<32x384xf32, #tpu.memory_space<vmem>>, vector<8x384xf32>
    %64 = vector.extract_strided_slice %63 {offsets = [0, 0], sizes = [8, 128], strides = [1, 1]} : vector<8x384xf32> to vector<8x128xf32>
    %65 = vector.extract_strided_slice %59 {offsets = [0, 0], sizes = [8, 128], strides = [1, 1]} : vector<8x384xf32> to vector<8x128xf32>
    %66 = arith.addf %64, %65 : vector<8x128xf32>
    %67 = arith.negf %66 : vector<8x128xf32>
    %68 = math.exp %67 : vector<8x128xf32>
    %cst_31 = arith.constant 1.000000e+00 : f32
    %69 = vector.broadcast %cst_31 : f32 to vector<8x128xf32>
    %70 = arith.addf %69, %68 : vector<8x128xf32>
    %71 = arith.divf %69, %70 : vector<8x128xf32>
    %72 = vector.extract_strided_slice %63 {offsets = [0, 128], sizes = [8, 128], strides = [1, 1]} : vector<8x384xf32> to vector<8x128xf32>
    %73 = vector.extract_strided_slice %59 {offsets = [0, 128], sizes = [8, 128], strides = [1, 1]} : vector<8x384xf32> to vector<8x128xf32>
    %74 = arith.addf %72, %73 : vector<8x128xf32>
    %75 = arith.negf %74 : vector<8x128xf32>
    %76 = math.exp %75 : vector<8x128xf32>
    %cst_32 = arith.constant 1.000000e+00 : f32
    %77 = vector.broadcast %cst_32 : f32 to vector<8x128xf32>
    %78 = arith.addf %77, %76 : vector<8x128xf32>
    %79 = arith.divf %77, %78 : vector<8x128xf32>
    %80 = vector.extract_strided_slice %63 {offsets = [0, 256], sizes = [8, 128], strides = [1, 1]} : vector<8x384xf32> to vector<8x128xf32>
    %81 = vector.extract_strided_slice %59 {offsets = [0, 256], sizes = [8, 128], strides = [1, 1]} : vector<8x384xf32> to vector<8x128xf32>
    %82 = arith.mulf %71, %81 : vector<8x128xf32>
    %83 = arith.addf %80, %82 : vector<8x128xf32>
    %84 = math.tanh %83 : vector<8x128xf32>
    %cst_33 = arith.constant 1.000000e+00 : f32
    %85 = vector.broadcast %cst_33 : f32 to vector<8x128xf32>
    %86 = arith.subf %85, %79 : vector<8x128xf32>
    %87 = arith.mulf %86, %84 : vector<8x128xf32>
    %88 = arith.mulf %79, %55 : vector<8x128xf32>
    %89 = arith.addf %87, %88 : vector<8x128xf32>
    %c2_i32 = arith.constant 2 : i32
    %90 = arith.truncf %89 : vector<8x128xf32> to vector<8x128xbf16>
    %cst_34 = arith.constant dense<0.000000e+00> : vector<8x384xf32>
    %91 = tpu.matmul %90, %2, %cst_34 {dimension_numbers = #tpu.dot_dimension_numbers<[1], [0], [0], [1], [0, 0, 1, 1], [], []>} : vector<8x128xbf16>, vector<128x384xbf16>, vector<8x384xf32> -> vector<8x384xf32>
    %92 = vector.broadcast %6 : vector<1x384xf32> to vector<8x384xf32>
    %93 = arith.addf %91, %92 : vector<8x384xf32>
    %c8_i32_35 = arith.constant 8 : i32
    %94 = arith.muli %c2_i32, %c8_i32_35 : i32
    %95 = tpu.assume_multiple %94, 8 : i32
    %96 = arith.index_cast %95 : i32 to index
    %c0_36 = arith.constant 0 : index
    %97 = vector.load %arg13[%96, %c0_36] : memref<32x384xf32, #tpu.memory_space<vmem>>, vector<8x384xf32>
    %98 = vector.extract_strided_slice %97 {offsets = [0, 0], sizes = [8, 128], strides = [1, 1]} : vector<8x384xf32> to vector<8x128xf32>
    %99 = vector.extract_strided_slice %93 {offsets = [0, 0], sizes = [8, 128], strides = [1, 1]} : vector<8x384xf32> to vector<8x128xf32>
    %100 = arith.addf %98, %99 : vector<8x128xf32>
    %101 = arith.negf %100 : vector<8x128xf32>
    %102 = math.exp %101 : vector<8x128xf32>
    %cst_37 = arith.constant 1.000000e+00 : f32
    %103 = vector.broadcast %cst_37 : f32 to vector<8x128xf32>
    %104 = arith.addf %103, %102 : vector<8x128xf32>
    %105 = arith.divf %103, %104 : vector<8x128xf32>
    %106 = vector.extract_strided_slice %97 {offsets = [0, 128], sizes = [8, 128], strides = [1, 1]} : vector<8x384xf32> to vector<8x128xf32>
    %107 = vector.extract_strided_slice %93 {offsets = [0, 128], sizes = [8, 128], strides = [1, 1]} : vector<8x384xf32> to vector<8x128xf32>
    %108 = arith.addf %106, %107 : vector<8x128xf32>
    %109 = arith.negf %108 : vector<8x128xf32>
    %110 = math.exp %109 : vector<8x128xf32>
    %cst_38 = arith.constant 1.000000e+00 : f32
    %111 = vector.broadcast %cst_38 : f32 to vector<8x128xf32>
    %112 = arith.addf %111, %110 : vector<8x128xf32>
    %113 = arith.divf %111, %112 : vector<8x128xf32>
    %114 = vector.extract_strided_slice %97 {offsets = [0, 256], sizes = [8, 128], strides = [1, 1]} : vector<8x384xf32> to vector<8x128xf32>
    %115 = vector.extract_strided_slice %93 {offsets = [0, 256], sizes = [8, 128], strides = [1, 1]} : vector<8x384xf32> to vector<8x128xf32>
    %116 = arith.mulf %105, %115 : vector<8x128xf32>
    %117 = arith.addf %114, %116 : vector<8x128xf32>
    %118 = math.tanh %117 : vector<8x128xf32>
    %cst_39 = arith.constant 1.000000e+00 : f32
    %119 = vector.broadcast %cst_39 : f32 to vector<8x128xf32>
    %120 = arith.subf %119, %113 : vector<8x128xf32>
    %121 = arith.mulf %120, %118 : vector<8x128xf32>
    %122 = arith.mulf %113, %89 : vector<8x128xf32>
    %123 = arith.addf %121, %122 : vector<8x128xf32>
    %c3_i32 = arith.constant 3 : i32
    %124 = arith.truncf %123 : vector<8x128xf32> to vector<8x128xbf16>
    %cst_40 = arith.constant dense<0.000000e+00> : vector<8x384xf32>
    %125 = tpu.matmul %124, %2, %cst_40 {dimension_numbers = #tpu.dot_dimension_numbers<[1], [0], [0], [1], [0, 0, 1, 1], [], []>} : vector<8x128xbf16>, vector<128x384xbf16>, vector<8x384xf32> -> vector<8x384xf32>
    %126 = vector.broadcast %6 : vector<1x384xf32> to vector<8x384xf32>
    %127 = arith.addf %125, %126 : vector<8x384xf32>
    %c8_i32_41 = arith.constant 8 : i32
    %128 = arith.muli %c3_i32, %c8_i32_41 : i32
    %129 = tpu.assume_multiple %128, 8 : i32
    %130 = arith.index_cast %129 : i32 to index
    %c0_42 = arith.constant 0 : index
    %131 = vector.load %arg13[%130, %c0_42] : memref<32x384xf32, #tpu.memory_space<vmem>>, vector<8x384xf32>
    %132 = vector.extract_strided_slice %131 {offsets = [0, 0], sizes = [8, 128], strides = [1, 1]} : vector<8x384xf32> to vector<8x128xf32>
    %133 = vector.extract_strided_slice %127 {offsets = [0, 0], sizes = [8, 128], strides = [1, 1]} : vector<8x384xf32> to vector<8x128xf32>
    %134 = arith.addf %132, %133 : vector<8x128xf32>
    %135 = arith.negf %134 : vector<8x128xf32>
    %136 = math.exp %135 : vector<8x128xf32>
    %cst_43 = arith.constant 1.000000e+00 : f32
    %137 = vector.broadcast %cst_43 : f32 to vector<8x128xf32>
    %138 = arith.addf %137, %136 : vector<8x128xf32>
    %139 = arith.divf %137, %138 : vector<8x128xf32>
    %140 = vector.extract_strided_slice %131 {offsets = [0, 128], sizes = [8, 128], strides = [1, 1]} : vector<8x384xf32> to vector<8x128xf32>
    %141 = vector.extract_strided_slice %127 {offsets = [0, 128], sizes = [8, 128], strides = [1, 1]} : vector<8x384xf32> to vector<8x128xf32>
    %142 = arith.addf %140, %141 : vector<8x128xf32>
    %143 = arith.negf %142 : vector<8x128xf32>
    %144 = math.exp %143 : vector<8x128xf32>
    %cst_44 = arith.constant 1.000000e+00 : f32
    %145 = vector.broadcast %cst_44 : f32 to vector<8x128xf32>
    %146 = arith.addf %145, %144 : vector<8x128xf32>
    %147 = arith.divf %145, %146 : vector<8x128xf32>
    %148 = vector.extract_strided_slice %131 {offsets = [0, 256], sizes = [8, 128], strides = [1, 1]} : vector<8x384xf32> to vector<8x128xf32>
    %149 = vector.extract_strided_slice %127 {offsets = [0, 256], sizes = [8, 128], strides = [1, 1]} : vector<8x384xf32> to vector<8x128xf32>
    %150 = arith.mulf %139, %149 : vector<8x128xf32>
    %151 = arith.addf %148, %150 : vector<8x128xf32>
    %152 = math.tanh %151 : vector<8x128xf32>
    %cst_45 = arith.constant 1.000000e+00 : f32
    %153 = vector.broadcast %cst_45 : f32 to vector<8x128xf32>
    %154 = arith.subf %153, %147 : vector<8x128xf32>
    %155 = arith.mulf %154, %152 : vector<8x128xf32>
    %156 = arith.mulf %147, %123 : vector<8x128xf32>
    %157 = arith.addf %155, %156 : vector<8x128xf32>
    %c4_i32 = arith.constant 4 : i32
    %c0_46 = arith.constant 0 : index
    %c0_47 = arith.constant 0 : index
    %158 = vector.load %arg8[%c0_46, %c0_47] : memref<2x64xbf16, #tpu.memory_space<vmem>>, vector<2x64xbf16>
    %159 = vector.extract_strided_slice %1 {offsets = [0, 0], sizes = [64, 384], strides = [1, 1]} : vector<128x384xbf16> to vector<64x384xbf16>
    %cst_48 = arith.constant dense<0.000000e+00> : vector<2x384xf32>
    %160 = tpu.matmul %158, %159, %cst_48 {dimension_numbers = #tpu.dot_dimension_numbers<[1], [0], [0], [1], [0, 0, 1, 1], [], []>} : vector<2x64xbf16>, vector<64x384xbf16>, vector<2x384xf32> -> vector<2x384xf32>
    %c0_49 = arith.constant 0 : index
    %c0_50 = arith.constant 0 : index
    %161 = vector.load %arg9[%c0_49, %c0_50] : memref<8x64xbf16, #tpu.memory_space<vmem>>, vector<8x64xbf16>
    %162 = vector.extract_strided_slice %1 {offsets = [64, 0], sizes = [64, 384], strides = [1, 1]} : vector<128x384xbf16> to vector<64x384xbf16>
    %cst_51 = arith.constant dense<0.000000e+00> : vector<8x384xf32>
    %163 = tpu.matmul %161, %162, %cst_51 {dimension_numbers = #tpu.dot_dimension_numbers<[1], [0], [0], [1], [0, 0, 1, 1], [], []>} : vector<8x64xbf16>, vector<64x384xbf16>, vector<8x384xf32> -> vector<8x384xf32>
    %164 = vector.broadcast %5 : vector<1x384xf32> to vector<8x384xf32>
    %165 = arith.addf %163, %164 : vector<8x384xf32>
    %166 = arith.truncf %157 : vector<8x128xf32> to vector<8x128xbf16>
    %cst_52 = arith.constant dense<0.000000e+00> : vector<8x384xf32>
    %167 = tpu.matmul %166, %2, %cst_52 {dimension_numbers = #tpu.dot_dimension_numbers<[1], [0], [0], [1], [0, 0, 1, 1], [], []>} : vector<8x128xbf16>, vector<128x384xbf16>, vector<8x384xf32> -> vector<8x384xf32>
    %168 = vector.broadcast %6 : vector<1x384xf32> to vector<8x384xf32>
    %169 = arith.addf %167, %168 : vector<8x384xf32>
    %170 = vector.shape_cast %160 : vector<2x384xf32> to vector<2x1x384xf32>
    %171 = vector.shape_cast %170 : vector<2x1x384xf32> to vector<2x1x384xf32>
    %172 = vector.broadcast %171 : vector<2x1x384xf32> to vector<2x8x384xf32>
    %173 = vector.shape_cast %165 : vector<8x384xf32> to vector<1x8x384xf32>
    %174 = vector.shape_cast %173 : vector<1x8x384xf32> to vector<1x8x384xf32>
    %175 = vector.broadcast %174 : vector<1x8x384xf32> to vector<2x8x384xf32>
    %176 = arith.addf %172, %175 : vector<2x8x384xf32>
    %177 = vector.shape_cast %169 : vector<8x384xf32> to vector<1x8x384xf32>
    %178 = vector.shape_cast %177 : vector<1x8x384xf32> to vector<1x8x384xf32>
    %179 = vector.broadcast %178 : vector<1x8x384xf32> to vector<2x8x384xf32>
    %180 = vector.shape_cast %157 : vector<8x128xf32> to vector<1x8x128xf32>
    %181 = vector.shape_cast %180 : vector<1x8x128xf32> to vector<1x8x128xf32>
    %182 = vector.broadcast %181 : vector<1x8x128xf32> to vector<2x8x128xf32>
    %183 = vector.extract_strided_slice %176 {offsets = [0, 0, 0], sizes = [2, 8, 128], strides = [1, 1, 1]} : vector<2x8x384xf32> to vector<2x8x128xf32>
    %184 = vector.extract_strided_slice %179 {offsets = [0, 0, 0], sizes = [2, 8, 128], strides = [1, 1, 1]} : vector<2x8x384xf32> to vector<2x8x128xf32>
    %185 = arith.addf %183, %184 : vector<2x8x128xf32>
    %186 = arith.negf %185 : vector<2x8x128xf32>
    %187 = math.exp %186 : vector<2x8x128xf32>
    %cst_53 = arith.constant 1.000000e+00 : f32
    %188 = vector.broadcast %cst_53 : f32 to vector<2x8x128xf32>
    %189 = arith.addf %188, %187 : vector<2x8x128xf32>
    %190 = arith.divf %188, %189 : vector<2x8x128xf32>
    %191 = vector.extract_strided_slice %176 {offsets = [0, 0, 128], sizes = [2, 8, 128], strides = [1, 1, 1]} : vector<2x8x384xf32> to vector<2x8x128xf32>
    %192 = vector.extract_strided_slice %179 {offsets = [0, 0, 128], sizes = [2, 8, 128], strides = [1, 1, 1]} : vector<2x8x384xf32> to vector<2x8x128xf32>
    %193 = arith.addf %191, %192 : vector<2x8x128xf32>
    %194 = arith.negf %193 : vector<2x8x128xf32>
    %195 = math.exp %194 : vector<2x8x128xf32>
    %cst_54 = arith.constant 1.000000e+00 : f32
    %196 = vector.broadcast %cst_54 : f32 to vector<2x8x128xf32>
    %197 = arith.addf %196, %195 : vector<2x8x128xf32>
    %198 = arith.divf %196, %197 : vector<2x8x128xf32>
    %199 = vector.extract_strided_slice %176 {offsets = [0, 0, 256], sizes = [2, 8, 128], strides = [1, 1, 1]} : vector<2x8x384xf32> to vector<2x8x128xf32>
    %200 = vector.extract_strided_slice %179 {offsets = [0, 0, 256], sizes = [2, 8, 128], strides = [1, 1, 1]} : vector<2x8x384xf32> to vector<2x8x128xf32>
    %201 = arith.mulf %190, %200 : vector<2x8x128xf32>
    %202 = arith.addf %199, %201 : vector<2x8x128xf32>
    %203 = math.tanh %202 : vector<2x8x128xf32>
    %cst_55 = arith.constant 1.000000e+00 : f32
    %204 = vector.broadcast %cst_55 : f32 to vector<2x8x128xf32>
    %205 = arith.subf %204, %198 : vector<2x8x128xf32>
    %206 = arith.mulf %205, %203 : vector<2x8x128xf32>
    %207 = arith.mulf %198, %182 : vector<2x8x128xf32>
    %208 = arith.addf %206, %207 : vector<2x8x128xf32>
    %209 = vector.shape_cast %208 : vector<2x8x128xf32> to vector<16x128xf32>
    %210 = arith.truncf %209 : vector<16x128xf32> to vector<16x128xbf16>
    %cst_56 = arith.constant dense<0.000000e+00> : vector<16x8xf32>
    %211 = tpu.matmul %210, %3, %cst_56 {dimension_numbers = #tpu.dot_dimension_numbers<[1], [0], [0], [1], [0, 0, 1, 1], [], []>} : vector<16x128xbf16>, vector<128x8xbf16>, vector<16x8xf32> -> vector<16x8xf32>
    %212 = vector.broadcast %7 : vector<1x8xf32> to vector<16x8xf32>
    %213 = arith.addf %211, %212 : vector<16x8xf32>
    %214 = vector.shape_cast %213 : vector<16x8xf32> to vector<2x8x8xf32>
    %c0_57 = arith.constant 0 : index
    %c0_58 = arith.constant 0 : index
    %c0_59 = arith.constant 0 : index
    %215 = vector.load %arg12[%c0_57, %c0_58, %c0_59] : memref<2x8x8xf32, #tpu.memory_space<vmem>>, vector<2x8x8xf32>
    tpu.vector_store %arg12[%c0_57, %c0_58, %c0_59], %214 {strides = array<i32>} : memref<2x8x8xf32, #tpu.memory_space<vmem>>, vector<2x8x8xf32>,
    return
  }
  func.func @transform_0(%arg0: i32) -> (i32, i32, i32) {
    %c0_i32 = arith.constant 0 : i32
    %c0_i32_0 = arith.constant 0 : i32
    %c0_i32_1 = arith.constant 0 : i32
    return %c0_i32, %arg0, %c0_i32_0 : i32, i32, i32
  }
  func.func @transform_1(%arg0: i32) -> (i32, i32) {
    %c0_i32 = arith.constant 0 : i32
    %c0_i32_0 = arith.constant 0 : i32
    %c0_i32_1 = arith.constant 0 : i32
    return %c0_i32, %c0_i32_0 : i32, i32
  }
  func.func @transform_2(%arg0: i32) -> (i32, i32) {
    %c0_i32 = arith.constant 0 : i32
    %c0_i32_0 = arith.constant 0 : i32
    %c0_i32_1 = arith.constant 0 : i32
    return %c0_i32, %c0_i32_0 : i32, i32
  }
  func.func @transform_3(%arg0: i32) -> (i32, i32) {
    %c0_i32 = arith.constant 0 : i32
    %c0_i32_0 = arith.constant 0 : i32
    %c0_i32_1 = arith.constant 0 : i32
    return %c0_i32, %c0_i32_0 : i32, i32
  }
  func.func @transform_4(%arg0: i32) -> (i32, i32) {
    %c0_i32 = arith.constant 0 : i32
    %c0_i32_0 = arith.constant 0 : i32
    %c0_i32_1 = arith.constant 0 : i32
    return %c0_i32, %c0_i32_0 : i32, i32
  }
  func.func @transform_5(%arg0: i32) -> (i32, i32) {
    %c0_i32 = arith.constant 0 : i32
    %c0_i32_0 = arith.constant 0 : i32
    %c0_i32_1 = arith.constant 0 : i32
    return %c0_i32, %c0_i32_0 : i32, i32
  }
  func.func @transform_6(%arg0: i32) -> (i32, i32) {
    %c0_i32 = arith.constant 0 : i32
    %c0_i32_0 = arith.constant 0 : i32
    %c0_i32_1 = arith.constant 0 : i32
    return %c0_i32, %c0_i32_0 : i32, i32
  }
  func.func @transform_7(%arg0: i32) -> (i32, i32) {
    %c0_i32 = arith.constant 0 : i32
    %c0_i32_0 = arith.constant 0 : i32
    %c0_i32_1 = arith.constant 0 : i32
    return %c0_i32, %c0_i32_0 : i32, i32
  }
  func.func @transform_8(%arg0: i32) -> (i32, i32) {
    %c0_i32 = arith.constant 0 : i32
    %c0_i32_0 = arith.constant 0 : i32
    return %arg0, %c0_i32 : i32, i32
  }
  func.func @transform_9(%arg0: i32) -> (i32, i32) {
    %c0_i32 = arith.constant 0 : i32
    %c0_i32_0 = arith.constant 0 : i32
    %c0_i32_1 = arith.constant 0 : i32
    return %c0_i32, %c0_i32_0 : i32, i32
  }
  func.func @transform_10(%arg0: i32) -> (i32, i32) {
    %c0_i32 = arith.constant 0 : i32
    %c0_i32_0 = arith.constant 0 : i32
    %c0_i32_1 = arith.constant 0 : i32
    return %c0_i32, %c0_i32_0 : i32, i32
  }
  func.func @transform_11(%arg0: i32) -> (i32, i32, i32) {
    %c0_i32 = arith.constant 0 : i32
    %c0_i32_0 = arith.constant 0 : i32
    %c0_i32_1 = arith.constant 0 : i32
    return %c0_i32, %arg0, %c0_i32_0 : i32, i32, i32
  }
}

</mosaic_0001>

<bundles_post_ra>
// kernel: segrnn_forward.1
= control target key start
LH: loop header
LB: loop body
LE: loop exit
PB: predicated region body
PF: predicated region fallthrough
CT: control target
= control target key end

     0   :  { %16 = vsyncpa [#allocation5], 0  ;;  %s2687_s17 = smov 0   ;;  %s2689_s18 = smov 0   ;;  %s3394_s0 = inlined_call_operand.vmem [shape: f32[4,16,8], index: 0, kind: input, shape index: {}]   ;;  %s3395_s1 = inlined_call_operand.vmem [shape: bf16[8,128], index: 1, kind: input, shape index: {}]   ;;  %s3396_s2 = inlined_call_operand.vmem [shape: f32[1,128], index: 2, kind: input, shape index: {}]   ;;  %s3397_s3 = inlined_call_operand.vmem [shape: bf16[128,384], index: 3, kind: input, shape index: {}]   ;;  %s3398_s4 = inlined_call_operand.hbm [shape: bf16[128,384], index: 4, kind: input, shape index: {}]   ;;  %s3399_s5 = inlined_call_operand.vmem [shape: f32[1,384], index: 5, kind: input, shape index: {}]   ;;  %s3400_s6 = inlined_call_operand.vmem [shape: f32[1,384], index: 6, kind: input, shape index: {}]   ;;  %s3401_s7 = inlined_call_operand.vmem [shape: bf16[2,64], index: 7, kind: input, shape index: {}]   ;;  %s3402_s8 = inlined_call_operand.vmem [shape: bf16[16,64], index: 8, kind: input, shape index: {}]   ;;  %s3403_s9 = inlined_call_operand.vmem [shape: bf16[128,8], index: 9, kind: input, shape index: {}]   ;;  %s3404_s10 = inlined_call_operand.vmem [shape: f32[1,8], index: 10, kind: input, shape index: {}]   ;;  %s3405_s11 = inlined_call_operand.vmem [shape: f32[2,16,8], index: 11, kind: output, shape index: {}]  }
   0x1   :  { %s2691_s19 = smov 0  }
   0x2 LB: > { %s2703_s20 = sadd.s32 4294967295, %s2618_s19   ;;  %s2706_s21 = sadd.s32 1, %s2618_s19   ;;  %s2618_s19 = sphi %s2691_s19, %s3499_s19   ;;  %s2614_s18 = sphi %s2689_s18, %s3502_s18   ;;  %s2610_s17 = sphi %s2687_s17, %s3501_s17  }
   0x3   : > { %3438 = sst [smem:[#allocation8_spill]] %s2706_s21  ;;  %s26_s22 = ssub.s32 %s2618_s19, %s2706_s21 }
   0x4   : > { %s29_s23 = sadd.s32 1, %s2614_s18  ;;  %p27_p0 = scmp.eq.s32.totalorder %s26_s22, 0 }
   0x5   : > { %p36_p1 = scmp.ne.s32.totalorder %s2614_s18, %s2610_s17  ;;  %p37_p2 = scmp.eq.s32.totalorder %s2618_s19, 0 }
   0x6   : > { %p281_p3 = scmp.eq.s32.totalorder %s2703_s20, 1  ;;  %p2053_p6 = scmp.ge.s32.totalorder %s2618_s19, 1 }
   0x7   : > { %s2716_s24 = scalar_select %p27_p0, %s2614_s18, %s29_s23  }
   0x8   : > { %p2718_p4 = por %p37_p2, %p36_p1  ;;  %p2722_p5 = por %p281_p3, %p36_p1 }
   0x9   : > { %3439 = sst [smem:[#allocation9_spill]] %s2716_s24  ;;  %p294_p7 = scmp.lt.s32.totalorder %s2618_s19, 3 }
   0xa   : > { %s3440_s25 = scalar_select %p2718_p4, 1, 0 }
   0xb   : > { %s3441_s26 = scalar_select %p2722_p5, 1, 0 }
   0xc   : > { %p3406_p8 = scmp.eq.s32.totalorder %s2703_s20, 0  ;;  %p2729_p9 = pnand %p2053_p6, %p294_p7 }
   0xd   : > { %s2620_s28 = smov [#allocation4]   ;;  %s2564_s14 = scalar_lea.hbm %s3398_s4, 3072 }
   0xe   : > { %s3442_s27 = scalar_select %p2729_p9, 1, 0 }
   0xf   : > { %s315_s29 = sshll.u32 %s2620_s28, 4  ;;  %p2395_p10 = pneg %p2729_p9  ;;  %s316_s29 = int_to_ptr.vmem [resolvable:$true] %s315_s29 }
  0x10   : > { %p2565_p12 = scmp.ne.s32.totalorder %s3398_s4, %s2564_s14  ;;  %p2571_p2 = scmp.lt.u32.totalorder %s2564_s14, %s3398_s4 }
  0x11   : > { %p2737_p11 = pnand %p3406_p8, %p2395_p10 }
  0x13   : > { %p2566_p13 = pneg %p2737_p11 }
  0x15   : > { %p2567_p0 = pnand %p2566_p13, %p2565_p12 }
  0x17   : > { %p2568_p1 = pneg %p2567_p0 }
  0x19   : > { %p2573_p3 = pnand %p2571_p2, %p2568_p1 }
  0x1b   : > { %2576 = shalt.err (!%p2573_p3)
}
  0x1c   : > { %s2577_s28 = scalar_lea.vmem %s316_s29, 3072  ;;  %p2585_p8 = scmp.lt.s32.totalorder %s316_s29, %s316_s29 }
  0x1d   : > { %p2578_p6 = scmp.ne.s32.totalorder %s316_s29, %s2577_s28  ;;  %p2586_p5 = scmp.lt.s32.totalorder %s2577_s28, %s2577_s28 }
  0x1f   : > { %p2580_p7 = pnand %p2578_p6, %p2566_p13  ;;  %p2587_p9 = por %p2586_p5, %p2585_p8 }
  0x21   : > { %p2581_p10 = pneg %p2580_p7 }
  0x23   : > { %p2588_p4 = pnand %p2587_p9, %p2581_p10 }
  0x25   : > { %2591 = shalt.err (!%p2588_p4)
}
  0x26   : > { %s2621_s12 = smov 192   ;;  %s2622_s13 = smov 12  }
  0x27   : > { %2398 = dma.hbm_to_vmem [thread:$0]  (!%p2737_p11), %s3398_s4, 3072, %s316_s29, [#allocation5], %s2621_s12, %s2621_s12, %s2622_s13  }
  0x28   : > { %p2055_p12 = scmp.ge.s32.totalorder %s2618_s19, 2 }
  0x29   : > { %p3444_p0 = scmp.ne.s32.totalorder (!%p2055_p12), %s3440_s25, 0 }
  0x2a   : > { %340 = sbr.rel (%p2055_p12) target bundleno = 56 (0x38), region = 52 }
  0x31   : > { %343 = sbr.rel (!%p3444_p0) target bundleno = 56 (0x38), region = 56  ;;  %s345_s14 = sand.u32 (%p3444_p0), 1, %s2614_s18  }
  0x32   : > { %s2057_s22 = sshll.u32 (%p3444_p0), %s2618_s19, 3  ;;  %s2056_s23 = sshll.u32 (%p3444_p0), %s345_s14, 5 }
  0x33   : > { %s349_s21 = scalar_lea.vmem (%p3444_p0), %s3394_s0, %s2057_s22  ;;  %s347_s30 = scalar_lea.vmem (%p3444_p0), [#allocation3], %s2056_s23 }
  0x34   : > { %v383_v0 = vld [vmem:[%s349_s21] sm:$0xff] (%p3444_p0)  ;;  %v385_v1 = vld [vmem:[%s349_s21 + $0x10] sm:$0xff] (%p3444_p0) }
  0x35   : > { %v387_v2 = vld [vmem:[%s349_s21 + $0x20] sm:$0xff] (%p3444_p0)  ;;  %384 = vst [vmem:[%s347_s30] sm:$0xff] (%p3444_p0), %v383_v0  ;;  %386 = vst [vmem:[%s347_s30 + $0x8] sm:$0xff] (%p3444_p0), %v385_v1  ;;  %v389_v3 = vld [vmem:[%s349_s21 + $0x30] sm:$0xff] (%p3444_p0) }
  0x36   : > { %388 = vst [vmem:[%s347_s30 + $0x10] sm:$0xff] (%p3444_p0), %v387_v2  ;;  %390 = vst [vmem:[%s347_s30 + $0x18] sm:$0xff] (%p3444_p0), %v389_v3 }
  0x38 PF: > { %p3445_p4 = scmp.ne.s32.totalorder %s3442_s27, 0 }
  0x3a   : > { %406 = sbr.rel (%p3445_p4) target bundleno = 1868 (0x74c), region = 98 }
  0x41   : > { %s409_s19 = sand.u32 1, %s2610_s17   ;;  %p3446_p5 = scmp.eq.s32.totalorder %s2703_s20, 0 }
  0x42   : > { %s2059_s24 = sshll.u32 %s409_s19, 5 }
  0x43   : > { %s411_s25 = scalar_lea.vmem [#allocation3], %s2059_s24 }
  0x44   : > { %2605 = dma.done.wait (%p3446_p5), [#allocation5], 3072   ;;  %p3447_p8 = pmov %p3446_p5 }
  0x45   : > { %vm564_vm0 = vcmask 1043456   ;;  %v460_v4 = vld [vmem:[%s3395_s1] sm:$0xf]  ;;  %v546_v6 = vld [vmem:[%s411_s25 + $0x8] sm:$0xff]  ;;  %vm557_vm1 = vcmask 64512   ;;  %v547_v9 = vld [vmem:[%s411_s25 + $0x10] sm:$0xff] }
  0x46   : > { %2607 = vsyncadd (%p3447_p8), [#allocation5], 4294964224  ;;  %v545_v5 = vld [vmem:[%s411_s25] sm:$0xff]  ;;  %2390 = vmatprep.subr.msk.bf16.mxu0 %vm564_vm0, %v460_v4  ;;  %v566_v7 = vsel %vm564_vm0, %v460_v4, 0  ;;  %v548_v10 = vld [vmem:[%s411_s25 + $0x18] sm:$0xff]  ;;  %v3410_v37 = vmov 0  }
  0x47   : > { %v549_v8 = vpack.c.bf16 %v546_v6, %v545_v5  ;;  %2221 = vmatpush3.bf16.msra.mxu0 %v566_v7  ;;  %v550_v11 = vpack.c.bf16 %v548_v10, %v547_v9  ;;  %v2780_v12 = vld [vmem:[%s3397_s3 + $0x4] ss:$12 sps:$4 sm:$0xff]   ;;  %v2785_v13 = vld [vmem:[%s3397_s3] ss:$12 sps:$4 sm:$0xff]   ;;  %v2791_v14 = vld [vmem:[%s3397_s3 + $0x8] ss:$12 sps:$4 sm:$0xff]   ;;  %799 = vmatprep.mubr.bf16.mxu1 %v3410_v37 }
  0x48   : > { %3448 = vst [vmem:[#allocation10_spill] sm:$0xff] %v2791_v14  ;;  %767 = vmatprep.subr.bf16.mxu1 %v2780_v12  ;;  %v2797_v15 = vld [vmem:[%s3397_s3 + $0x1c] ss:$12 sps:$4 sm:$0xff]   ;;  %v2804_v16 = vld [vmem:[%s3397_s3 + $0x18] ss:$12 sps:$4 sm:$0xff]   ;;  %2226 = vmatprep.subr.bf16.mxu0 %v2791_v14  ;;  %v3412_v38 = vmov 0.0  }
  0x49   : > { %2222 = vmatprep.mubr.msk.bf16.mxu0 %vm557_vm1, %v549_v8  ;;  %768 = vmatpush1.bf16.msra.mxu1 %v2785_v13  ;;  %v2811_v17 = vld [vmem:[%s3397_s3 + $0x20] ss:$12 sps:$4 sm:$0xff]   ;;  %v2823_v19 = vld [vmem:[%s3397_s3 + $0x38] ss:$12 sps:$4 sm:$0xff]   ;;  %v2829_v20 = vld [vmem:[%s3397_s3 + $0x30] ss:$12 sps:$4 sm:$0xff]  }
  0x4a   : > { %2223 = vmatmul.mubr.msk.bf16.vlgmr.msra.gmra.mrb[0].mxu0 %vm557_vm1, %v550_v11  ;;  %769 = vmatprep.subr.bf16.mxu1 %v2797_v15  ;;  %3449 = vst [vmem:[#allocation11_spill] sm:$0xff] %v2811_v17  ;;  %v2817_v18 = vld [vmem:[%s3397_s3 + $0x34] ss:$12 sps:$4 sm:$0xff]   ;;  %3451 = vst [vmem:[#allocation13_spill] sm:$0xff] %v2823_v19  ;;  %v2835_v21 = vld [vmem:[%s3397_s3 + $0x4c] ss:$12 sps:$4 sm:$0xff]  }
  0x4b   : > { %2227 = vmatpush3.bf16.msra.mxu0 %v2791_v14  ;;  %3450 = vst [vmem:[#allocation12_spill] sm:$0xff] %v2817_v18  ;;  %3452 = vst [vmem:[#allocation14_spill] sm:$0xff] %v2829_v20  ;;  %v2842_v22 = vld [vmem:[%s3397_s3 + $0x50] ss:$12 sps:$4 sm:$0xff]   ;;  %v2848_v23 = vld [vmem:[%s3397_s3 + $0x48] ss:$12 sps:$4 sm:$0xff]  }
  0x4c   : > { %2228 = vmatprep.subr.bf16.mxu0 %v2811_v17  ;;  %3453 = vst [vmem:[#allocation15_spill] sm:$0xff] %v2835_v21  ;;  %3454 = vst [vmem:[#allocation16_spill] sm:$0xff] %v2842_v22  ;;  %v2854_v24 = vld [vmem:[%s3397_s3 + $0x64] ss:$12 sps:$4 sm:$0xff]   ;;  %v2860_v25 = vld [vmem:[%s3397_s3 + $0x60] ss:$12 sps:$4 sm:$0xff]  }
  0x4d   : > { %770 = vmatpush1.bf16.msra.mxu1 %v2804_v16  ;;  %3455 = vst [vmem:[#allocation17_spill] sm:$0xff] %v2848_v23  ;;  %v2865_v26 = vld [vmem:[%s3397_s3 + $0x68] ss:$12 sps:$4 sm:$0xff]   ;;  %v2878_v28 = vld [vmem:[%s3397_s3 + $0x80] ss:$12 sps:$4 sm:$0xff]   ;;  %vm2625_vm2 = vmmov 0  }
  0x4e   : > { %771 = vmatprep.subr.bf16.mxu1 %v2817_v18  ;;  %3456 = vst [vmem:[#allocation18_spill] sm:$0xff] %v2865_v26  ;;  %v2871_v27 = vld [vmem:[%s3397_s3 + $0x7c] ss:$12 sps:$4 sm:$0xff]   ;;  %3457 = vst [vmem:[#allocation19_spill] sm:$0xff] %v2878_v28  ;;  %v2884_v29 = vld [vmem:[%s3397_s3 + $0x78] ss:$12 sps:$4 sm:$0xff]  }
  0x4f   : > { %2229 = vmatpush3.bf16.msra.mxu0 %v2811_v17  ;;  %3458 = vst [vmem:[#allocation20_spill] sm:$0xff] %v2884_v29  ;;  %v2896_v30 = vld [vmem:[%s3397_s3 + $0x94] ss:$12 sps:$4 sm:$0xff]   ;;  %v2901_v31 = vld [vmem:[%s3397_s3 + $0x90] ss:$12 sps:$4 sm:$0xff]   ;;  %vm1461_vm3 = vcmask 523264  }
  0x50   : > { %2230 = vmatprep.subr.bf16.mxu0 %v2823_v19  ;;  %3459 = vst [vmem:[#allocation21_spill] sm:$0xff] %v2896_v30  ;;  %3460 = vst [vmem:[#allocation22_spill] sm:$0xff] %v2901_v31  ;;  %v2907_v32 = vld [vmem:[%s3397_s3 + $0x98] ss:$12 sps:$4 sm:$0xff]   ;;  %v2920_v34 = vld [vmem:[%s3397_s3 + $0xa8] ss:$12 sps:$4 sm:$0xff]  }
  0x51   : > { %772 = vmatpush1.bf16.msra.mxu1 %v2829_v20  ;;  %3461 = vst [vmem:[#allocation23_spill] sm:$0xff] %v2907_v32  ;;  %v2914_v33 = vld [vmem:[%s3397_s3 + $0xac] ss:$12 sps:$4 sm:$0xff]   ;;  %3463 = vst [vmem:[#allocation25_spill] sm:$0xff] %v2920_v34  ;;  %v2926_v35 = vld [vmem:[%s3397_s3 + $0xb0] ss:$12 sps:$4 sm:$0xff]  }
  0x52   : > { %773 = vmatprep.subr.bf16.mxu1 %v2835_v21  ;;  %3462 = vst [vmem:[#allocation24_spill] sm:$0xff] %v2914_v33  ;;  %3464 = vst [vmem:[#allocation26_spill] sm:$0xff] %v2926_v35  ;;  %v2930_v36 = vld [vmem:[#allocation4 + $0x4] ss:$12 sps:$4 sm:$0xff]   ;;  %v2063_v39 = vld [vmem:[%s3396_s2] ss:$0 sm:$0xff] }
  0x53   : > { %2231 = vmatpush3.bf16.msra.mxu0 %v2823_v19  ;;  %v2939_v53 = vld [vmem:[#allocation4] ss:$12 sps:$4 sm:$0xff]   ;;  %v2941_v55 = vld [vmem:[#allocation4 + $0x1c] ss:$12 sps:$4 sm:$0xff]   ;;  %v2946_v57 = vld [vmem:[#allocation4 + $0x18] ss:$12 sps:$4 sm:$0xff]  }
  0x54   : > { %2232 = vmatprep.subr.bf16.mxu0 %v2842_v22  ;;  %v2943_v56 = vld [vmem:[#allocation4 + $0x8] ss:$12 sps:$4 sm:$0xff]   ;;  %v2953_v59 = vld [vmem:[#allocation4 + $0x20] ss:$12 sps:$4 sm:$0xff]   ;;  %v2959_v60 = vld [vmem:[#allocation4 + $0x30] ss:$12 sps:$4 sm:$0xff]  }
  0x55   : > { %774 = vmatpush1.bf16.msra.mxu1 %v2848_v23  ;;  %v2950_v58 = vld [vmem:[#allocation4 + $0x34] ss:$12 sps:$4 sm:$0xff]   ;;  %v2962_v61 = vld [vmem:[#allocation4 + $0x4c] ss:$12 sps:$4 sm:$0xff]   ;;  %v2973_v0 = vld [vmem:[#allocation4 + $0x64] ss:$12 sps:$4 sm:$0xff]  }
  0x56   : > { %775 = vmatprep.subr.bf16.mxu1 %v2854_v24  ;;  %v2965_v62 = vld [vmem:[#allocation4 + $0x38] ss:$12 sps:$4 sm:$0xff]   ;;  %v2969_v63 = vld [vmem:[#allocation4 + $0x48] ss:$12 sps:$4 sm:$0xff]   ;;  %v2976_v1 = vld [vmem:[#allocation4 + $0x50] ss:$12 sps:$4 sm:$0xff]  }
  0x57   : > { %2233 = vmatpush3.bf16.msra.mxu0 %v2842_v22  ;;  %v2980_v2 = vld [vmem:[#allocation4 + $0x60] ss:$12 sps:$4 sm:$0xff]   ;;  %v2983_v3 = vld [vmem:[#allocation4 + $0x7c] ss:$12 sps:$4 sm:$0xff]   ;;  %v2990_v5 = vld [vmem:[#allocation4 + $0x78] ss:$12 sps:$4 sm:$0xff]  }
  0x58   : > { %2234 = vmatprep.subr.bf16.mxu0 %v2865_v26  ;;  %v2986_v4 = vld [vmem:[#allocation4 + $0x68] ss:$12 sps:$4 sm:$0xff]   ;;  %v2996_v7 = vld [vmem:[#allocation4 + $0x80] ss:$12 sps:$4 sm:$0xff]   ;;  %v3000_v8 = vld [vmem:[#allocation4 + $0x90] ss:$12 sps:$4 sm:$0xff]  }
  0x59   : > { %776 = vmatpush1.bf16.msra.mxu1 %v2860_v25  ;;  %v2993_v6 = vld [vmem:[#allocation4 + $0x94] ss:$12 sps:$4 sm:$0xff]   ;;  %v3003_v9 = vld [vmem:[#allocation4 + $0xac] ss:$12 sps:$4 sm:$0xff]   ;;  %p455_p9 = scmp.lt.s32.totalorder %s2703_s20, 1  ;;  %s2061_s23 = sshll.u32 %s409_s19, 4 }
  0x5a   : > { %777 = vmatprep.subr.bf16.mxu1 %v2871_v27  ;;  %v3006_v10 = vld [vmem:[#allocation4 + $0x98] ss:$12 sps:$4 sm:$0xff]   ;;  %v3010_v11 = vld [vmem:[#allocation4 + $0xa8] ss:$12 sps:$4 sm:$0xff]   ;;  %s454_s24 = scalar_lea.vmem [#allocation6], %s2061_s23  ;;  %p3498_p11 = scmp.ne.s32.totalorder %s3441_s26, 0 }
  0x5b   : > { %2235 = vmatpush3.bf16.msra.mxu0 %v2865_v26  ;;  %s456_s27 = scalar_select %p455_p9, %s2703_s20, 1 }
  0x5c   : > { %2236 = vmatprep.subr.bf16.mxu0 %v2878_v28  ;;  %s2140_s17 = sshll.u32 (%p3498_p11), %s2703_s20, 3 }
  0x5d   : > { %778 = vmatpush1.bf16.msra.mxu1 %v2884_v29  ;;  %s2062_s12 = sshll.u32 %s456_s27, 2  ;;  %s1931_s21 = scalar_lea.vmem (%p3498_p11), %s3405_s11, %s2140_s17 }
  0x5e   : > { %779 = vmatprep.subr.bf16.mxu1 %v2896_v30  ;;  %s458_s16 = scalar_lea.vmem %s3402_s8, %s2062_s12 }
  0x5f   : > { %2237 = vmatpush3.bf16.msra.mxu0 %v2878_v28 }
  0x60   : > { %2238 = vmatprep.subr.bf16.mxu0 %v2907_v32 }
  0x61   : > { %780 = vmatpush1.bf16.msra.mxu1 %v2901_v31 }
  0x62   : > { %781 = vmatprep.subr.bf16.mxu1 %v2914_v33 }
  0x63   : > { %2239 = vmatpush3.bf16.msra.mxu0 %v2907_v32 }
  0x64   : > { %2240 = vmatprep.subr.bf16.mxu0 %v2926_v35 }
  0x65   : > { %782 = vmatpush1.bf16.msra.mxu1 %v2920_v34 }
  0x66   : > { %1025 = vmatprep.subr.bf16.mxu1 %v2930_v36 }
  0x67   : > { %2241 = vmatpush3.bf16.msra.mxu0 %v2926_v35  ;;  %v543_v35 = vld [vmem:[%s3400_s6] sm:$0x7] }
  0x68   : > { %2246 = vmatprep.subr.bf16.mxu0 %v3412_v38 }
 0x11d   : > { %v2224_v40 = vpop.f32.mrb[0].mxu0 }
 0x11e   : > { %v611_v41 = vadd.f32 %v2224_v40, %v2063_v39  ;;  %v602_v42 = vpop.f32.mrb[1].mxu0 }
 0x11f   : > { %v603_v43 = vadd.f32 %v2063_v39, %v602_v42  ;;  %v2225_v44 = vpop.f32.mrb[2].mxu0 }
 0x120   : > { %v614_v45 = vadd.f32 %v2225_v44, %v2063_v39  ;;  %v605_v46 = vpop.f32.mrb[3].mxu0  ;;  %v619_v48 = vmax.f32 %v611_v41, 0.0 }
 0x121   : > { %v606_v47 = vadd.f32 %v2063_v39, %v605_v46  ;;  %v617_v50 = vmax.f32 %v603_v43, 0.0  ;;  %v3014_v39 = vld [vmem:[#allocation4 + $0xb0] ss:$12 sps:$4 sm:$0xff]  }
 0x122   : > { %v620_v49 = vmax.f32 %v614_v45, 0.0 }
 0x123   : > { %v618_v51 = vmax.f32 %v606_v47, 0.0 }
 0x124   : > { %v622_v52 = vpack.c.bf16 %v620_v49, %v619_v48 }
 0x125   : > { %v621_v54 = vpack.c.bf16 %v618_v51, %v617_v50 }
 0x127   : > { %800 = vmatmul.mubr.bf16.vlgmr.msra.gmra.mrb[0].mxu1 %v621_v54  ;;  %2242 = vmatprep.mubr.bf16.mxu0 %v621_v54 }
 0x128   : > { %1026 = vmatpush1.bf16.msra.mxu1 %v2939_v53  ;;  %2243 = vmatmul.mubr.bf16.vlgmr.msra.gmra.mrb[4].mxu0 %v622_v52 }
 0x129   : > { %1027 = vmatprep.subr.bf16.mxu1 %v2941_v55  ;;  %809 = vmatprep.mubr.bf16.mxu1 %v3410_v37 }
 0x12a   : > { %2247 = vmatpush3.bf16.msra.mxu0 %v2943_v56  ;;  %2262 = vmatprep.mubr.msk.bf16.mxu0 %vm2625_vm2, %v3412_v38 }
 0x12b   : > { %2248 = vmatprep.subr.bf16.mxu0 %v3412_v38 }
 0x12c   : > { %1028 = vmatpush1.bf16.msra.mxu1 %v2946_v57 }
 0x12d   : > { %1029 = vmatprep.subr.bf16.mxu1 %v2950_v58 }
 0x12e   : > { %2249 = vmatpush3.bf16.msra.mxu0 %v2953_v59 }
 0x12f   : > { %810 = vmatmul.mubr.bf16.gmra.mrb[4].mxu1 %v622_v52  ;;  %2250 = vmatprep.subr.bf16.mxu0 %v3412_v38  ;;  %v624_v52 = vlaneseq }
 0x130   : > { %1030 = vmatpush1.bf16.msra.mxu1 %v2959_v60  ;;  %1057 = vmatprep.mubr.bf16.mxu1 %v3410_v37 }
 0x131   : > { %1031 = vmatprep.subr.bf16.mxu1 %v2962_v61  ;;  %v3076_v54 = vshrl.u32 %v624_v52, 7 }
 0x132   : > { %2251 = vmatpush3.bf16.msra.mxu0 %v2965_v62 }
 0x133   : > { %2252 = vmatprep.subr.bf16.mxu0 %v3412_v38  ;;  %3468 = vst [vmem:[#allocation30_spill] sm:$0xff] %v3076_v54 }
 0x134   : > { %1032 = vmatpush1.bf16.msra.mxu1 %v2969_v63 }
 0x135   : > { %1033 = vmatprep.subr.bf16.mxu1 %v2973_v0 }
 0x136   : > { %2253 = vmatpush3.bf16.msra.mxu0 %v2976_v1 }
 0x137   : > { %2254 = vmatprep.subr.bf16.mxu0 %v3412_v38 }
 0x138   : > { %1034 = vmatpush1.bf16.msra.mxu1 %v2980_v2 }
 0x139   : > { %1035 = vmatprep.subr.bf16.mxu1 %v2983_v3 }
 0x13a   : > { %2255 = vmatpush3.bf16.msra.mxu0 %v2986_v4 }
 0x13b   : > { %2256 = vmatprep.subr.bf16.mxu0 %v3412_v38 }
 0x13c   : > { %1036 = vmatpush1.bf16.msra.mxu1 %v2990_v5 }
 0x13d   : > { %1037 = vmatprep.subr.bf16.mxu1 %v2993_v6 }
 0x13e   : > { %2257 = vmatpush3.bf16.msra.mxu0 %v2996_v7 }
 0x13f   : > { %2258 = vmatprep.subr.bf16.mxu0 %v3412_v38 }
 0x140   : > { %1038 = vmatpush1.bf16.msra.mxu1 %v3000_v8 }
 0x141   : > { %1039 = vmatprep.subr.bf16.mxu1 %v3003_v9 }
 0x142   : > { %2259 = vmatpush3.bf16.msra.mxu0 %v3006_v10 }
 0x143   : > { %2260 = vmatprep.subr.bf16.mxu0 %v3412_v38 }
 0x144   : > { %1040 = vmatpush1.bf16.msra.mxu1 %v3010_v11 }
 0x145   : > { %1134 = vmatprep.subr.bf16.mxu1 %v2930_v36 }
 0x146   : > { %2261 = vmatpush3.bf16.msra.mxu0 %v3014_v39 }
 0x147   : > { %1058 = vmatmul.mubr.bf16.vlgmr.msra.gmra.mrb[8].mxu1 %v3410_v37  ;;  %2266 = vmatprep.subr.bf16.mxu0 %v3412_v38 }
 0x148   : > { %1135 = vmatpush1.bf16.msra.mxu1 %v2939_v53  ;;  %1166 = vmatprep.mubr.bf16.mxu1 %v3410_v37 }
 0x149   : > { %2263 = vmatmul.mubr.bf16.vlgmr.msra.gmra.mrb[8].mxu0 %v3410_v37  ;;  %1136 = vmatprep.subr.bf16.mxu1 %v2941_v55  ;;  %v3079_v37 = vsub.s32 0, %v3076_v54 }
 0x14a   : > { %2267 = vmatpush3.bf16.msra.mxu0 %v2943_v56  ;;  %2282 = vmatprep.mubr.msk.bf16.mxu0 %vm2625_vm2, %v3412_v38 }
 0x14b   : > { %2268 = vmatprep.subr.bf16.mxu0 %v3412_v38  ;;  %3469 = vst [vmem:[#allocation31_spill] sm:$0xff] %v3079_v37  ;;  %v3094_v52 = vrot.slane %v543_v35, %v3079_v37 }
 0x14c   : > { %1137 = vmatpush1.bf16.msra.mxu1 %v2946_v57 }
 0x14d   : > { %1138 = vmatprep.subr.bf16.mxu1 %v2950_v58 }
 0x14e   : > { %2269 = vmatpush3.bf16.msra.mxu0 %v2953_v59 }
 0x14f   : > { %2270 = vmatprep.subr.bf16.mxu0 %v3412_v38 }
 0x150   : > { %1139 = vmatpush1.bf16.msra.mxu1 %v2959_v60 }
 0x151   : > { %1140 = vmatprep.subr.bf16.mxu1 %v2962_v61 }
 0x152   : > { %2271 = vmatpush3.bf16.msra.mxu0 %v2965_v62 }
 0x153   : > { %2272 = vmatprep.subr.bf16.mxu0 %v3412_v38 }
 0x154   : > { %1141 = vmatpush1.bf16.msra.mxu1 %v2969_v63 }
 0x155   : > { %1142 = vmatprep.subr.bf16.mxu1 %v2973_v0 }
 0x156   : > { %2273 = vmatpush3.bf16.msra.mxu0 %v2976_v1 }
 0x157   : > { %2274 = vmatprep.subr.bf16.mxu0 %v3412_v38 }
 0x158   : > { %1143 = vmatpush1.bf16.msra.mxu1 %v2980_v2 }
 0x159   : > { %1144 = vmatprep.subr.bf16.mxu1 %v2983_v3 }
 0x15a   : > { %2275 = vmatpush3.bf16.msra.mxu0 %v2986_v4 }
 0x15b   : > { %2276 = vmatprep.subr.bf16.mxu0 %v3412_v38 }
 0x15c   : > { %1145 = vmatpush1.bf16.msra.mxu1 %v2990_v5 }
 0x15d   : > { %1146 = vmatprep.subr.bf16.mxu1 %v2993_v6 }
 0x15e   : > { %2277 = vmatpush3.bf16.msra.mxu0 %v2996_v7 }
 0x15f   : > { %2278 = vmatprep.subr.bf16.mxu0 %v3412_v38 }
 0x160   : > { %1147 = vmatpush1.bf16.msra.mxu1 %v3000_v8 }
 0x161   : > { %1148 = vmatprep.subr.bf16.mxu1 %v3003_v9 }
 0x162   : > { %2279 = vmatpush3.bf16.msra.mxu0 %v3006_v10 }
 0x163   : > { %2280 = vmatprep.subr.bf16.mxu0 %v3412_v38 }
 0x164   : > { %1149 = vmatpush1.bf16.msra.mxu1 %v3010_v11 }
 0x165   : > { %1243 = vmatprep.subr.bf16.mxu1 %v2930_v36 }
 0x166   : > { %2281 = vmatpush3.bf16.msra.mxu0 %v3014_v39 }
 0x167   : > { %2286 = vmatprep.subr.bf16.mxu0 %v3412_v38  ;;  %v542_v38 = vld [vmem:[%s3399_s5] sm:$0x7] }
 0x1fa   : > { %v801_v40 = vpop.f32.mrb[0].mxu1 }
 0x1fb   : > { %v803_v41 = vpop.f32.mrb[1].mxu1  ;;  %v3058_v42 = vpop.f32.mrb[4].mxu0 }
 0x1fc   : > { %v3060_v43 = vpop.f32.mrb[2].mxu1  ;;  %v854_v44 = vpop.f32.mrb[5].mxu0 }
 0x1fd   : > { %v3062_v45 = vpop.f32.mrb[3].mxu1  ;;  %v3064_v46 = vpop.f32.mrb[6].mxu0 }
 0x1fe   : > { %3465 = vst [vmem:[#allocation27_spill] sm:$0xff] %v3064_v46  ;;  %v3066_v47 = vpop.f32.mrb[7].mxu0  ;;  %v3085_v46 = vsub.s32 1, %v3076_v54 }
 0x200   : > { %3470 = vst [vmem:[#allocation32_spill] sm:$0xff] %v3085_v46  ;;  %v3100_v32 = vrot.slane %v543_v35, %v3085_v46 }
 0x202   : > { %v3068_v48 = vpop.f32.mrb[4].mxu1 }
 0x203   : > { %v3070_v49 = vpop.f32.mrb[5].mxu1 }
 0x204   : > { %v3072_v50 = vpop.f32.mrb[6].mxu1 }
 0x205   : > { %3466 = vst [vmem:[#allocation28_spill] sm:$0xff] %v3072_v50  ;;  %v3074_v51 = vpop.f32.mrb[7].mxu1  ;;  %v3091_v50 = vrot.slane %v542_v38, %v3079_v37 }
 0x206   : > { %3467 = vst [vmem:[#allocation29_spill] sm:$0xff] %v3074_v51  ;;  %v3097_v51 = vrot.slane %v542_v38, %v3085_v46 }
 0x207   : > { %v802_v26 = vadd.f32 %v801_v40, %v3091_v50 }
 0x208   : > { %v804_v17 = vadd.f32 %v803_v41, %v3097_v51  ;;  %v3473_v41 = vmov 0  }
 0x21a   : > { %v1059_v28 = vpop.f32.mrb[8].mxu1 }
 0x21b   : > { %v1060_v22 = vadd.f32 %v1059_v28, %v3094_v52  ;;  %v1061_v19 = vpop.f32.mrb[9].mxu1  ;;  %v3107_v28 = vsub.s32 2, %v3076_v54 }
 0x21c   : > { %v1062_v14 = vadd.f32 %v1061_v19, %v3100_v32  ;;  %v1063_v34 = vpop.f32.mrb[10].mxu1  ;;  %v1100_v23 = vpop.f32.mrb[8].mxu0 }
 0x21d   : > { %v1112_v37 = vadd.f32 %v1060_v22, %v802_v26  ;;  %v1064_v33 = vpop.f32.mrb[11].mxu1  ;;  %v2264_v31 = vpop.f32.mrb[9].mxu0  ;;  %3471 = vst [vmem:[#allocation33_spill] sm:$0xff] %v3107_v28  ;;  %v3110_v19 = vrot.slane %v543_v35, %v3107_v28  ;;  %v3113_v22 = vrot.slane %v542_v38, %v3107_v28 }
 0x21e   : > { %v1119_v21 = vadd.f32 %v1062_v14, %v804_v17  ;;  %v1103_v20 = vpop.f32.mrb[10].mxu0 }
 0x21f   : > { %v2114_v30 = vmul.f32 -1.442695, %v1112_v37  ;;  %v2265_v46 = vpop.f32.mrb[11].mxu0  ;;  %v1101_v17 = vadd.f32 %v1100_v23, %v3110_v19  ;;  %v3472_v23 = vmov 0.0  }
 0x220   : > { %v2115_v29 = vmul.f32 -1.442695, %v1119_v21  ;;  %v855_v21 = vadd.f32 %v854_v44, %v3113_v22 }
 0x221   : > { %2504 = vpow2.f32 %v2114_v30 }
 0x222   : > { %2506 = vpow2.f32 %v2115_v29 }
 0x22b   : > { %v2505_v40 = vpop.eup %2504 }
 0x22c   : > { %v1116_v18 = vadd.f32 1.0, %v2505_v40  ;;  %v2507_v34 = vpop.eup %2506  ;;  %v806_v40 = vadd.f32 %v3060_v43, %v3091_v50 }
 0x22d   : > { %v1123_v14 = vadd.f32 1.0, %v2507_v34 }
 0x22e   : > { %2508 = vrcp.f32 %v1116_v18 }
 0x22f   : > { %2510 = vrcp.f32 %v1123_v14 }
 0x238   : > { %v2509_v20 = vpop.eup %2508 }
 0x239   : > { %v1126_v26 = vmul.f32 %v2509_v20, %v1101_v17  ;;  %v2511_v18 = vpop.eup %2510  ;;  %v808_v20 = vadd.f32 %v3062_v45, %v3097_v51 }
 0x23a   : > { %v1129_v30 = vsub.f32 1.0, %v2511_v18  ;;  %v1131_v35 = vmul.f32 0.0, %v2511_v18 }
 0x23b   : > { %v1127_v29 = vadd.f32 %v1126_v26, %v855_v21 }
 0x23d   : > { %2512 = vtanh.f32 %v1127_v29 }
 0x247   : > { %v2513_v31 = vpop.eup %2512 }
 0x248   : > { %v1130_v33 = vmul.f32 %v2513_v31, %v1129_v30 }
 0x24a   : > { %v3117_v37 = vadd.f32 %v1131_v35, %v1130_v33 }
 0x24c   : > { %v1133_v38 = vpack.c.bf16 %v3117_v37, %v3117_v37 }
 0x24e   : > { %1167 = vmatmul.mubr.bf16.vlgmr.msra.gmra.mrb[12].mxu1 %v1133_v38  ;;  %2283 = vmatmul.mubr.bf16.vlgmr.msra.gmra.mrb[12].mxu0 %v1133_v38 }
 0x24f   : > { %1244 = vmatpush1.bf16.msra.mxu1 %v2939_v53  ;;  %2287 = vmatpush3.bf16.msra.mxu0 %v2943_v56 }
 0x250   : > { %1245 = vmatprep.subr.bf16.mxu1 %v2941_v55  ;;  %2288 = vmatprep.subr.bf16.mxu0 %v3472_v23 }
 0x251   : > { %1275 = vmatprep.mubr.bf16.mxu1 %v3473_v41  ;;  %2302 = vmatprep.mubr.msk.bf16.mxu0 %vm2625_vm2, %v3472_v23 }
 0x253   : > { %1246 = vmatpush1.bf16.msra.mxu1 %v2946_v57  ;;  %2289 = vmatpush3.bf16.msra.mxu0 %v2953_v59 }
 0x254   : > { %1247 = vmatprep.subr.bf16.mxu1 %v2950_v58  ;;  %2290 = vmatprep.subr.bf16.mxu0 %v3472_v23 }
 0x257   : > { %1248 = vmatpush1.bf16.msra.mxu1 %v2959_v60  ;;  %2291 = vmatpush3.bf16.msra.mxu0 %v2965_v62 }
 0x258   : > { %1249 = vmatprep.subr.bf16.mxu1 %v2962_v61  ;;  %2292 = vmatprep.subr.bf16.mxu0 %v3472_v23 }
 0x25b   : > { %1250 = vmatpush1.bf16.msra.mxu1 %v2969_v63  ;;  %2293 = vmatpush3.bf16.msra.mxu0 %v2976_v1 }
 0x25c   : > { %1251 = vmatprep.subr.bf16.mxu1 %v2973_v0  ;;  %2294 = vmatprep.subr.bf16.mxu0 %v3472_v23 }
 0x25f   : > { %1252 = vmatpush1.bf16.msra.mxu1 %v2980_v2  ;;  %2295 = vmatpush3.bf16.msra.mxu0 %v2986_v4 }
 0x260   : > { %1253 = vmatprep.subr.bf16.mxu1 %v2983_v3  ;;  %2296 = vmatprep.subr.bf16.mxu0 %v3472_v23 }
 0x263   : > { %1254 = vmatpush1.bf16.msra.mxu1 %v2990_v5  ;;  %2297 = vmatpush3.bf16.msra.mxu0 %v2996_v7 }
 0x264   : > { %1255 = vmatprep.subr.bf16.mxu1 %v2993_v6  ;;  %2298 = vmatprep.subr.bf16.mxu0 %v3472_v23 }
 0x267   : > { %1256 = vmatpush1.bf16.msra.mxu1 %v3000_v8  ;;  %2299 = vmatpush3.bf16.msra.mxu0 %v3006_v10 }
 0x268   : > { %1257 = vmatprep.subr.bf16.mxu1 %v3003_v9  ;;  %2300 = vmatprep.subr.bf16.mxu0 %v3472_v23 }
 0x26b   : > { %1258 = vmatpush1.bf16.msra.mxu1 %v3010_v11  ;;  %2301 = vmatpush3.bf16.msra.mxu0 %v3014_v39 }
 0x26c   : > { %1352 = vmatprep.subr.bf16.mxu1 %v2930_v36  ;;  %2306 = vmatprep.subr.bf16.mxu0 %v3472_v23 }
 0x321   : > { %v1168_v44 = vpop.f32.mrb[12].mxu1  ;;  %v1209_v46 = vpop.f32.mrb[12].mxu0 }
 0x322   : > { %v1169_v34 = vadd.f32 %v1168_v44, %v3094_v52  ;;  %v1170_v14 = vpop.f32.mrb[13].mxu1  ;;  %v2284_v17 = vpop.f32.mrb[13].mxu0  ;;  %v1210_v54 = vadd.f32 %v1209_v46, %v3110_v19 }
 0x323   : > { %v1171_v21 = vadd.f32 %v1170_v14, %v3100_v32  ;;  %v1172_v26 = vpop.f32.mrb[14].mxu1  ;;  %v1212_v29 = vpop.f32.mrb[14].mxu0  ;;  %v858_v14 = vadd.f32 %v3066_v47, %v3113_v22 }
 0x324   : > { %v1221_v18 = vadd.f32 %v1169_v34, %v806_v40  ;;  %v1173_v30 = vpop.f32.mrb[15].mxu1  ;;  %v2285_v31 = vpop.f32.mrb[15].mxu0 }
 0x325   : > { %v1228_v33 = vadd.f32 %v1171_v21, %v808_v20 }
 0x326   : > { %v2116_v35 = vmul.f32 -1.442695, %v1221_v18 }
 0x327   : > { %v2117_v38 = vmul.f32 -1.442695, %v1228_v33 }
 0x328   : > { %2514 = vpow2.f32 %v2116_v35  ;;  %v814_v35 = vadd.f32 %v3070_v49, %v3097_v51 }
 0x329   : > { %2516 = vpow2.f32 %v2117_v38 }
 0x332   : > { %v2515_v43 = vpop.eup %2514 }
 0x333   : > { %v1225_v28 = vadd.f32 1.0, %v2515_v43  ;;  %v2517_v44 = vpop.eup %2516 }
 0x334   : > { %v1232_v17 = vadd.f32 1.0, %v2517_v44 }
 0x335   : > { %2518 = vrcp.f32 %v1225_v28 }
 0x336   : > { %2520 = vrcp.f32 %v1232_v17 }
 0x33f   : > { %v2519_v45 = vpop.eup %2518 }
 0x340   : > { %v1235_v26 = vmul.f32 %v2519_v45, %v1210_v54  ;;  %v2521_v34 = vpop.eup %2520 }
 0x341   : > { %v1238_v20 = vsub.f32 1.0, %v2521_v34  ;;  %v1240_v18 = vmul.f32 %v2521_v34, %v3117_v37  ;;  %v812_v37 = vadd.f32 %v3068_v48, %v3091_v50 }
 0x342   : > { %v1236_v40 = vadd.f32 %v1235_v26, %v858_v14 }
 0x344   : > { %2522 = vtanh.f32 %v1236_v40 }
 0x34e   : > { %v2523_v21 = vpop.eup %2522 }
 0x34f   : > { %v1239_v29 = vmul.f32 %v2523_v21, %v1238_v20 }
 0x351   : > { %v3166_v30 = vadd.f32 %v1240_v18, %v1239_v29  ;;  %v863_v29 = vadd.f32 %v3058_v42, %v3113_v22  ;;  %v3474_v42 = vld [vmem:[#allocation12_spill] sm:$0xff] }
 0x353   : > { %v1242_v28 = vpack.c.bf16 %v3166_v30, %v3166_v30 }
 0x355   : > { %1276 = vmatmul.mubr.bf16.vlgmr.msra.gmra.mrb[16].mxu1 %v1242_v28  ;;  %2303 = vmatmul.mubr.bf16.vlgmr.msra.gmra.mrb[16].mxu0 %v1242_v28 }
 0x356   : > { %1353 = vmatpush1.bf16.msra.mxu1 %v2939_v53  ;;  %2307 = vmatpush3.bf16.msra.mxu0 %v2943_v56 }
 0x357   : > { %1354 = vmatprep.subr.bf16.mxu1 %v2941_v55  ;;  %2308 = vmatprep.subr.bf16.mxu0 %v3472_v23 }
 0x358   : > { %1384 = vmatprep.mubr.bf16.mxu1 %v3473_v41  ;;  %2322 = vmatprep.mubr.msk.bf16.mxu0 %vm2625_vm2, %v3472_v23 }
 0x35a   : > { %1355 = vmatpush1.bf16.msra.mxu1 %v2946_v57  ;;  %2309 = vmatpush3.bf16.msra.mxu0 %v2953_v59 }
 0x35b   : > { %1356 = vmatprep.subr.bf16.mxu1 %v2950_v58  ;;  %2310 = vmatprep.subr.bf16.mxu0 %v3472_v23 }
 0x35e   : > { %1357 = vmatpush1.bf16.msra.mxu1 %v2959_v60  ;;  %2311 = vmatpush3.bf16.msra.mxu0 %v2965_v62 }
 0x35f   : > { %1358 = vmatprep.subr.bf16.mxu1 %v2962_v61  ;;  %2312 = vmatprep.subr.bf16.mxu0 %v3472_v23 }
 0x362   : > { %1359 = vmatpush1.bf16.msra.mxu1 %v2969_v63  ;;  %2313 = vmatpush3.bf16.msra.mxu0 %v2976_v1 }
 0x363   : > { %1360 = vmatprep.subr.bf16.mxu1 %v2973_v0  ;;  %2314 = vmatprep.subr.bf16.mxu0 %v3472_v23 }
 0x366   : > { %1361 = vmatpush1.bf16.msra.mxu1 %v2980_v2  ;;  %2315 = vmatpush3.bf16.msra.mxu0 %v2986_v4 }
 0x367   : > { %1362 = vmatprep.subr.bf16.mxu1 %v2983_v3  ;;  %2316 = vmatprep.subr.bf16.mxu0 %v3472_v23 }
 0x36a   : > { %1363 = vmatpush1.bf16.msra.mxu1 %v2990_v5  ;;  %2317 = vmatpush3.bf16.msra.mxu0 %v2996_v7 }
 0x36b   : > { %1364 = vmatprep.subr.bf16.mxu1 %v2993_v6  ;;  %2318 = vmatprep.subr.bf16.mxu0 %v3472_v23 }
 0x36e   : > { %1365 = vmatpush1.bf16.msra.mxu1 %v3000_v8  ;;  %2319 = vmatpush3.bf16.msra.mxu0 %v3006_v10 }
 0x36f   : > { %1366 = vmatprep.subr.bf16.mxu1 %v3003_v9  ;;  %2320 = vmatprep.subr.bf16.mxu0 %v3472_v23 }
 0x372   : > { %1367 = vmatpush1.bf16.msra.mxu1 %v3010_v11  ;;  %2321 = vmatpush3.bf16.msra.mxu0 %v3014_v39 }
 0x373   : > { %1465 = vmatprep.subr.bf16.mxu0 %v2780_v12  ;;  %1550 = vmatprep.subr.bf16.mxu1 %v2854_v24 }
 0x428   : > { %v1277_v47 = vpop.f32.mrb[16].mxu1  ;;  %v1318_v54 = vpop.f32.mrb[16].mxu0 }
 0x429   : > { %v1278_v46 = vadd.f32 %v1277_v47, %v3094_v52  ;;  %v1279_v31 = vpop.f32.mrb[17].mxu1  ;;  %v2304_v33 = vpop.f32.mrb[17].mxu0  ;;  %v1319_v21 = vadd.f32 %v1318_v54, %v3110_v19  ;;  %v3476_v54 = vld [vmem:[#allocation21_spill] sm:$0xff] }
 0x42a   : > { %v1280_v38 = vadd.f32 %v1279_v31, %v3100_v32  ;;  %v1281_v43 = vpop.f32.mrb[18].mxu1  ;;  %v1321_v44 = vpop.f32.mrb[18].mxu0 }
 0x42b   : > { %v1330_v17 = vadd.f32 %v1278_v46, %v812_v37  ;;  %v1282_v12 = vpop.f32.mrb[19].mxu1  ;;  %v2305_v45 = vpop.f32.mrb[19].mxu0  ;;  %v3477_v43 = vld [vmem:[#allocation14_spill] sm:$0xff] }
 0x42c   : > { %v1337_v24 = vadd.f32 %v1280_v38, %v814_v35  ;;  %v3479_v44 = vld [vmem:[#allocation22_spill] sm:$0xff]  ;;  %v3484_v12 = vld [vmem:[#allocation11_spill] sm:$0xff]  ;;  %v3485_v45 = vld [vmem:[#allocation13_spill] sm:$0xff] }
 0x42d   : > { %v2118_v14 = vmul.f32 -1.442695, %v1330_v17  ;;  %v3483_v17 = vld [vmem:[#allocation10_spill] sm:$0xff] }
 0x42e   : > { %v2119_v26 = vmul.f32 -1.442695, %v1337_v24  ;;  %v3487_v24 = vld [vmem:[#allocation18_spill] sm:$0xff] }
 0x42f   : > { %2524 = vpow2.f32 %v2118_v14  ;;  %v3488_v14 = vld [vmem:[#allocation19_spill] sm:$0xff] }
 0x430   : > { %2526 = vpow2.f32 %v2119_v26  ;;  %v3489_v26 = vld [vmem:[#allocation23_spill] sm:$0xff] }
 0x439   : > { %v2525_v48 = vpop.eup %2524 }
 0x43a   : > { %v1334_v40 = vadd.f32 1.0, %v2525_v48  ;;  %v2527_v34 = vpop.eup %2526  ;;  %v3490_v48 = vld [vmem:[#allocation26_spill] sm:$0xff] }
 0x43b   : > { %v1341_v20 = vadd.f32 1.0, %v2527_v34  ;;  %v2626_v34 = vmov 1966171168  }
 0x43c   : > { %2528 = vrcp.f32 %v1334_v40  ;;  %v1546_v40 = vld [vmem:[%s458_s16] sm:$0xf] }
 0x43d   : > { %2530 = vrcp.f32 %v1341_v20  ;;  %v1718_v20 = vunpack.c.l.s4 %v2626_v34  ;;  %v2499_v34 = vld [vmem:[%s3403_s9 + $0x18] sm:$0xff]  }
 0x446   : > { %v2529_v49 = vpop.eup %2528 }
 0x447   : > { %v1344_v18 = vmul.f32 %v2529_v49, %v1319_v21  ;;  %v2531_v47 = vpop.eup %2530  ;;  %v1719_v49 = vunpack.c.0.s8 %v1718_v20  ;;  %v2500_v20 = vld [vmem:[%s3403_s9 + $0x20] sm:$0xff]  }
 0x448   : > { %v1347_v37 = vsub.f32 1.0, %v2531_v47  ;;  %v1349_v33 = vmul.f32 %v2531_v47, %v3166_v30  ;;  %v3475_v30 = vld [vmem:[#allocation20_spill] sm:$0xff] }
 0x449   : > { %v1345_v28 = vadd.f32 %v1344_v18, %v863_v29 }
 0x44b   : > { %2532 = vtanh.f32 %v1345_v28  ;;  %v3493_v28 = vld [vmem:[#allocation30_spill] sm:$0xff] }
 0x44c   : > { %v1722_v47 = vsub.s32 %v1719_v49, %v3493_v28  ;;  %v2502_v49 = vld [vmem:[%s3403_s9 + $0x30] sm:$0xff]  }
 0x455   : > { %v2533_v46 = vpop.eup %2532 }
 0x456   : > { %v1348_v31 = vmul.f32 %v2533_v46, %v1347_v37 }
 0x458   : > { %v3215_v35 = vadd.f32 %v1349_v33, %v1348_v31  ;;  %v3494_v31 = vld [vmem:[#allocation27_spill] sm:$0xff] }
 0x459   : > { %v866_v33 = vadd.f32 %v3494_v31, %v3113_v22 }
 0x45a   : > { %v1351_v38 = vpack.c.bf16 %v3215_v35, %v3215_v35 }
 0x45c   : > { %1385 = vmatmul.mubr.bf16.vlgmr.msra.gmra.mrb[20].mxu1 %v1351_v38  ;;  %2323 = vmatmul.mubr.bf16.vlgmr.msra.gmra.mrb[20].mxu0 %v1351_v38 }
 0x45d   : > { %1466 = vmatpush1.bf16.msra.mxu0 %v2785_v13  ;;  %1497 = vmatprep.mubr.bf16.mxu0 %v3473_v41  ;;  %v3478_v13 = vld [vmem:[#allocation15_spill] sm:$0xff] }
 0x45e   : > { %1467 = vmatprep.subr.bf16.mxu0 %v2797_v15  ;;  %1551 = vmatpush1.bf16.msra.mxu1 %v2860_v25  ;;  %v3480_v15 = vld [vmem:[#allocation24_spill] sm:$0xff]  ;;  %v3481_v25 = vld [vmem:[#allocation17_spill] sm:$0xff] }
 0x45f   : > { %1552 = vmatprep.subr.bf16.mxu1 %v2871_v27  ;;  %1582 = vmatprep.mubr.bf16.mxu1 %v3473_v41  ;;  %v3482_v27 = vld [vmem:[#allocation25_spill] sm:$0xff] }
 0x461   : > { %1468 = vmatpush1.bf16.msra.mxu0 %v2804_v16  ;;  %v1460_v16 = vld [vmem:[%s3401_s7] sm:$0x1] }
 0x462   : > { %1469 = vmatprep.subr.bf16.mxu0 %v3474_v42  ;;  %1553 = vmatpush1.bf16.msra.mxu1 %v3475_v30 }
 0x463   : > { %1554 = vmatprep.subr.bf16.mxu1 %v3476_v54 }
 0x465   : > { %1470 = vmatpush1.bf16.msra.mxu0 %v3477_v43 }
 0x466   : > { %1471 = vmatprep.subr.bf16.mxu0 %v3478_v13  ;;  %1555 = vmatpush1.bf16.msra.mxu1 %v3479_v44 }
 0x467   : > { %1556 = vmatprep.subr.bf16.mxu1 %v3480_v15 }
 0x469   : > { %1472 = vmatpush1.bf16.msra.mxu0 %v3481_v25 }
 0x46a   : > { %2326 = vmatprep.subr.bf16.mxu0 %v3472_v23  ;;  %1557 = vmatpush1.bf16.msra.mxu1 %v3482_v27 }
 0x46b   : > { %1632 = vmatprep.subr.bf16.mxu1 %v2930_v36  ;;  %v3486_v36 = vld [vmem:[#allocation16_spill] sm:$0xff] }
 0x46c   : > { %2122 = vmatmul.mubr.msk.bf16.vlgmr.msra.gmra.mrb[24].mxu0 %vm1461_vm3, %v1460_v16 }
 0x46d   : > { %2327 = vmatpush3.bf16.msra.mxu0 %v3483_v17  ;;  %2334 = vmatprep.mubr.msk.bf16.mxu0 %vm2625_vm2, %v3472_v23 }
 0x46e   : > { %2328 = vmatprep.subr.bf16.mxu0 %v3472_v23  ;;  %2124 = vmatmul.mubr.msk.bf16.vlgmr.msra.gmra.mrb[24].mxu1 %vm1461_vm3, %v1546_v40 }
 0x46f   : > { %1633 = vmatpush1.bf16.msra.mxu1 %v2939_v53  ;;  %1664 = vmatprep.mubr.bf16.mxu1 %v3473_v41 }
 0x470   : > { %1634 = vmatprep.subr.bf16.mxu1 %v2941_v55 }
 0x471   : > { %2329 = vmatpush3.bf16.msra.mxu0 %v3484_v12 }
 0x472   : > { %2330 = vmatprep.subr.bf16.mxu0 %v3472_v23 }
 0x473   : > { %1635 = vmatpush1.bf16.msra.mxu1 %v2946_v57 }
 0x474   : > { %1636 = vmatprep.subr.bf16.mxu1 %v2950_v58 }
 0x475   : > { %2331 = vmatpush3.bf16.msra.mxu0 %v3485_v45 }
 0x476   : > { %2332 = vmatprep.subr.bf16.mxu0 %v3472_v23 }
 0x477   : > { %1637 = vmatpush1.bf16.msra.mxu1 %v2959_v60 }
 0x478   : > { %1638 = vmatprep.subr.bf16.mxu1 %v2962_v61  ;;  %v3492_v61 = vld [vmem:[#allocation29_spill] sm:$0xff] }
 0x479   : > { %2333 = vmatpush3.bf16.msra.mxu0 %v3486_v36 }
 0x47a   : > { %2338 = vmatprep.subr.bf16.mxu0 %v3472_v23 }
 0x47b   : > { %1639 = vmatpush1.bf16.msra.mxu1 %v2969_v63 }
 0x47c   : > { %2335 = vmatmul.mubr.msk.bf16.vlgmr.msra.gmra.mrb[28].mxu0 %vm1461_vm3, %v1460_v16  ;;  %1640 = vmatprep.subr.bf16.mxu1 %v2973_v0 }
 0x47d   : > { %2339 = vmatpush3.bf16.msra.mxu0 %v3487_v24  ;;  %2346 = vmatprep.mubr.msk.bf16.mxu0 %vm2625_vm2, %v3472_v23 }
 0x47e   : > { %2340 = vmatprep.subr.bf16.mxu0 %v3472_v23 }
 0x47f   : > { %1641 = vmatpush1.bf16.msra.mxu1 %v2980_v2 }
 0x480   : > { %1642 = vmatprep.subr.bf16.mxu1 %v2983_v3 }
 0x481   : > { %2341 = vmatpush3.bf16.msra.mxu0 %v3488_v14 }
 0x482   : > { %2342 = vmatprep.subr.bf16.mxu0 %v3472_v23 }
 0x483   : > { %1643 = vmatpush1.bf16.msra.mxu1 %v2990_v5 }
 0x484   : > { %1644 = vmatprep.subr.bf16.mxu1 %v2993_v6 }
 0x485   : > { %2343 = vmatpush3.bf16.msra.mxu0 %v3489_v26 }
 0x486   : > { %2344 = vmatprep.subr.bf16.mxu0 %v3472_v23 }
 0x487   : > { %1645 = vmatpush1.bf16.msra.mxu1 %v3000_v8 }
 0x488   : > { %1646 = vmatprep.subr.bf16.mxu1 %v3003_v9 }
 0x489   : > { %2345 = vmatpush3.bf16.msra.mxu0 %v3490_v48 }
 0x48a   : > { %2350 = vmatprep.subr.bf16.mxu0 %v3472_v23 }
 0x48b   : > { %1647 = vmatpush1.bf16.msra.mxu1 %v3010_v11 }
 0x48c   : > { %2347 = vmatmul.mubr.msk.bf16.vlgmr.msra.gmra.mrb[32].mxu0 %vm1461_vm3, %v1546_v40  ;;  %2370 = vmatprep.subr.bf16.mxu1 %v3472_v23  ;;  %v3495_v40 = vld [vmem:[#allocation31_spill] sm:$0xff] }
 0x48d   : > { %2351 = vmatpush3.bf16.msra.mxu0 %v2943_v56  ;;  %2366 = vmatprep.mubr.msk.bf16.mxu0 %vm2625_vm2, %v3472_v23  ;;  %v3491_v56 = vld [vmem:[#allocation28_spill] sm:$0xff] }
 0x48e   : > { %2352 = vmatprep.subr.bf16.mxu0 %v3472_v23  ;;  %v816_v57 = vadd.f32 %v3491_v56, %v3091_v50  ;;  %v3496_v56 = vld [vmem:[#allocation33_spill] sm:$0xff] }
 0x491   : > { %2353 = vmatpush3.bf16.msra.mxu0 %v2953_v59 }
 0x492   : > { %2354 = vmatprep.subr.bf16.mxu0 %v3472_v23 }
 0x495   : > { %2355 = vmatpush3.bf16.msra.mxu0 %v2965_v62  ;;  %v818_v62 = vadd.f32 %v3492_v61, %v3097_v51 }
 0x496   : > { %2356 = vmatprep.subr.bf16.mxu0 %v3472_v23 }
 0x499   : > { %2357 = vmatpush3.bf16.msra.mxu0 %v2976_v1 }
 0x49a   : > { %2358 = vmatprep.subr.bf16.mxu0 %v3472_v23 }
 0x49d   : > { %2359 = vmatpush3.bf16.msra.mxu0 %v2986_v4 }
 0x49e   : > { %2360 = vmatprep.subr.bf16.mxu0 %v3472_v23 }
 0x4a1   : > { %2361 = vmatpush3.bf16.msra.mxu0 %v2996_v7 }
 0x4a2   : > { %2362 = vmatprep.subr.bf16.mxu0 %v3472_v23 }
 0x4a5   : > { %2363 = vmatpush3.bf16.msra.mxu0 %v3006_v10 }
 0x4a6   : > { %2364 = vmatprep.subr.bf16.mxu0 %v3472_v23 }
 0x4a9   : > { %2365 = vmatpush3.bf16.msra.mxu0 %v3014_v39 }
 0x52f   : > { %v1386_v53 = vpop.f32.mrb[20].mxu1  ;;  %v1427_v55 = vpop.f32.mrb[20].mxu0 }
 0x530   : > { %v1387_v58 = vadd.f32 %v1386_v53, %v3094_v52  ;;  %v1388_v59 = vpop.f32.mrb[21].mxu1  ;;  %v2324_v60 = vpop.f32.mrb[21].mxu0  ;;  %v1428_v37 = vadd.f32 %v1427_v55, %v3110_v19 }
 0x531   : > { %v1389_v63 = vadd.f32 %v1388_v59, %v3100_v32  ;;  %v1390_v0 = vpop.f32.mrb[22].mxu1  ;;  %v1430_v1 = vpop.f32.mrb[22].mxu0  ;;  %v3497_v59 = vld [vmem:[#allocation32_spill] sm:$0xff] }
 0x532   : > { %v1439_v2 = vadd.f32 %v1387_v58, %v816_v57  ;;  %v1391_v3 = vpop.f32.mrb[23].mxu1  ;;  %v2325_v4 = vpop.f32.mrb[23].mxu0 }
 0x533   : > { %v1446_v5 = vadd.f32 %v1389_v63, %v818_v62 }
 0x534   : > { %v2120_v6 = vmul.f32 -1.442695, %v1439_v2 }
 0x535   : > { %v2121_v7 = vmul.f32 -1.442695, %v1446_v5 }
 0x536   : > { %2534 = vpow2.f32 %v2120_v6 }
 0x537   : > { %2536 = vpow2.f32 %v2121_v7 }
 0x53f   : > { %v1499_v8 = vpop.f32.mrb[24].mxu0 }
 0x540   : > { %v2535_v9 = vpop.eup %2534  ;;  %v1501_v10 = vpop.f32.mrb[25].mxu0 }
 0x541   : > { %v1443_v11 = vadd.f32 1.0, %v2535_v9  ;;  %v1716_v39 = vcombine.low %v1499_v8, %v1501_v10  ;;  %v1503_v41 = vpop.f32.mrb[26].mxu0  ;;  %v2537_v29 = vpop.eup %2536 }
 0x542   : > { %v1504_v21 = vpop.f32.mrb[27].mxu0  ;;  %v1450_v18 = vadd.f32 1.0, %v2537_v29  ;;  %v1584_v58 = vpop.f32.mrb[24].mxu1  ;;  %v2503_v29 = vld [vmem:[%s3403_s9 + $0x38] sm:$0xff]  }
 0x543   : > { %2538 = vrcp.f32 %v1443_v11  ;;  %v1723_v42 = vrot.slane %v1716_v39, %v1722_v47  ;;  %v1585_v63 = vadd.f32 %v1584_v58, %v3091_v50  ;;  %v1586_v0 = vpop.f32.mrb[25].mxu1  ;;  %v2496_v50 = vld [vmem:[%s3403_s9] sm:$0xff]   ;;  %v2501_v21 = vld [vmem:[%s3403_s9 + $0x28] sm:$0xff]  }
 0x544   : > { %2540 = vrcp.f32 %v1450_v18  ;;  %v1587_v3 = vadd.f32 %v1586_v0, %v3097_v51  ;;  %v1588_v4 = vpop.f32.mrb[26].mxu1  ;;  %v2497_v51 = vld [vmem:[%s3403_s9 + $0x8] sm:$0xff]  }
 0x545   : > { %v1589_v8 = vpop.f32.mrb[27].mxu1 }
 0x54d   : > { %v2539_v46 = vpop.eup %2538 }
 0x54e   : > { %v1453_v38 = vmul.f32 %v2539_v46, %v1428_v37  ;;  %v2541_v27 = vpop.eup %2540 }
 0x54f   : > { %v1540_v30 = vpop.f32.mrb[28].mxu0  ;;  %v1456_v17 = vsub.f32 1.0, %v2541_v27  ;;  %v1458_v36 = vmul.f32 %v2541_v27, %v3215_v35 }
 0x550   : > { %v1454_v54 = vadd.f32 %v1453_v38, %v866_v33  ;;  %v1730_v43 = vrot.slane %v1540_v30, %v1722_v47  ;;  %v2336_v13 = vpop.f32.mrb[29].mxu0 }
 0x551   : > { %v1543_v44 = vpop.f32.mrb[30].mxu0 }
 0x552   : > { %2542 = vtanh.f32 %v1454_v54  ;;  %v1731_v15 = vcombine.low %v1723_v42, %v1730_v43  ;;  %v1732_v25 = vcombine.high %v1723_v42, %v1730_v43  ;;  %v2337_v16 = vpop.f32.mrb[31].mxu0 }
 0x554   : > { %v1739_v26 = vrot.slane %v1731_v15, %v1722_v47  ;;  %v1746_v48 = vrot.slane %v1732_v25, %v1722_v47 }
 0x556   : > { %v1750_v53 = vrot.slane %v1739_v26, %v3495_v40  ;;  %v1762_v55 = vrot.slane %v1746_v48, %v3495_v40  ;;  %v1758_v57 = vrot.slane %v1739_v26, %v3496_v56  ;;  %v1770_v35 = vrot.slane %v1746_v48, %v3496_v56 }
 0x557   : > { %v1754_v60 = vrot.slane %v1739_v26, %v3497_v59  ;;  %v1766_v61 = vrot.slane %v1746_v48, %v3497_v59 }
 0x558   : > { %v1777_v6 = vadd.f32 %v1750_v53, %v1585_v63  ;;  %v1780_v7 = vadd.f32 %v1762_v55, %v1585_v63 }
 0x559   : > { %v1778_v39 = vadd.f32 %v1754_v60, %v1587_v3  ;;  %v1781_v41 = vadd.f32 %v1766_v61, %v1587_v3 }
 0x55c   : > { %v2543_v12 = vpop.eup %2542 }
 0x55d   : > { %v1457_v45 = vmul.f32 %v2543_v12, %v1456_v17 }
 0x55f   : > { %v3314_v24 = vadd.f32 %v1458_v36, %v1457_v45  ;;  %v1625_v62 = vpop.f32.mrb[32].mxu0 }
 0x560   : > { %v1626_v1 = vadd.f32 %v1625_v62, %v3113_v22  ;;  %v2348_v2 = vpop.f32.mrb[33].mxu0  ;;  %v2498_v22 = vld [vmem:[%s3403_s9 + $0x10] sm:$0xff]  }
 0x561   : > { %v1631_v14 = vpack.c.bf16 %v3314_v24, %v3314_v24  ;;  %v1628_v5 = vpop.f32.mrb[34].mxu0 }
 0x562   : > { %v3329_v9 = vadd.f32 %v1758_v57, %v1626_v1  ;;  %v3331_v10 = vadd.f32 %v1770_v35, %v1626_v1  ;;  %v2349_v11 = vpop.f32.mrb[35].mxu0  ;;  %v2130_v5 = vld [vmem:[%s3404_s10] ss:$0 sm:$0xff] }
 0x563   : > { %1665 = vmatmul.mubr.bf16.vlgmr.msra.gmra.mrb[28].mxu1 %v1631_v14  ;;  %2367 = vmatmul.mubr.bf16.vlgmr.msra.gmra.mrb[36].mxu0 %v1631_v14 }
 0x564   : > { %2386 = vmatprep.mubr.msk.bf16.mxu1 %vm2625_vm2, %v3472_v23  ;;  %2371 = vmatpush3.bf16.msra.mxu1 %v2496_v50 }
 0x565   : > { %2372 = vmatprep.subr.bf16.mxu1 %v3472_v23 }
 0x568   : > { %2373 = vmatpush3.bf16.msra.mxu1 %v2497_v51 }
 0x569   : > { %2374 = vmatprep.subr.bf16.mxu1 %v3472_v23 }
 0x56c   : > { %2375 = vmatpush3.bf16.msra.mxu1 %v2498_v22 }
 0x56d   : > { %2376 = vmatprep.subr.bf16.mxu1 %v3472_v23 }
 0x570   : > { %2377 = vmatpush3.bf16.msra.mxu1 %v2499_v34 }
 0x571   : > { %2378 = vmatprep.subr.bf16.mxu1 %v3472_v23 }
 0x574   : > { %2379 = vmatpush3.bf16.msra.mxu1 %v2500_v20 }
 0x575   : > { %2380 = vmatprep.subr.bf16.mxu1 %v3472_v23 }
 0x578   : > { %2381 = vmatpush3.bf16.msra.mxu1 %v2501_v21 }
 0x579   : > { %2382 = vmatprep.subr.bf16.mxu1 %v3472_v23 }
 0x57c   : > { %2383 = vmatpush3.bf16.msra.mxu1 %v2502_v49 }
 0x57d   : > { %2384 = vmatprep.subr.bf16.mxu1 %v3472_v23 }
 0x580   : > { %2385 = vmatpush3.bf16.msra.mxu1 %v2503_v29 }
 0x636   : > { %v1666_v18 = vpop.f32.mrb[28].mxu1  ;;  %v1707_v28 = vpop.f32.mrb[36].mxu0 }
 0x637   : > { %v1667_v47 = vadd.f32 %v1666_v18, %v3094_v52  ;;  %v1668_v37 = vpop.f32.mrb[29].mxu1  ;;  %v2368_v46 = vpop.f32.mrb[37].mxu0  ;;  %v1708_v26 = vadd.f32 %v1707_v28, %v3110_v19 }
 0x638   : > { %v1669_v31 = vadd.f32 %v1668_v37, %v3100_v32  ;;  %v1670_v33 = vpop.f32.mrb[30].mxu1  ;;  %v1710_v38 = vpop.f32.mrb[38].mxu0 }
 0x639   : > { %v1783_v42 = vadd.f32 %v1777_v6, %v1667_v47  ;;  %v1784_v30 = vadd.f32 %v1780_v7, %v1667_v47  ;;  %v1671_v54 = vpop.f32.mrb[31].mxu1  ;;  %v2369_v43 = vpop.f32.mrb[39].mxu0 }
 0x63a   : > { %v1797_v13 = vadd.f32 %v1778_v39, %v1669_v31  ;;  %v1798_v44 = vadd.f32 %v1781_v41, %v1669_v31 }
 0x63b   : > { %v2126_v15 = vmul.f32 -1.442695, %v1783_v42  ;;  %v2127_v25 = vmul.f32 -1.442695, %v1784_v30 }
 0x63c   : > { %v2128_v23 = vmul.f32 -1.442695, %v1797_v13  ;;  %v2129_v16 = vmul.f32 -1.442695, %v1798_v44 }
 0x63d   : > { %2544 = vpow2.f32 %v2126_v15 }
 0x63e   : > { %2546 = vpow2.f32 %v2127_v25 }
 0x63f   : > { %2548 = vpow2.f32 %v2128_v23 }
 0x640   : > { %2550 = vpow2.f32 %v2129_v16 }
 0x647   : > { %v2545_v52 = vpop.eup %2544 }
 0x648   : > { %v2547_v27 = vpop.eup %2546  ;;  %v1791_v17 = vadd.f32 1.0, %v2545_v52 }
 0x649   : > { %v1792_v32 = vadd.f32 1.0, %v2547_v27  ;;  %v2549_v12 = vpop.eup %2548 }
 0x64a   : > { %2552 = vrcp.f32 %v1791_v17  ;;  %v2551_v45 = vpop.eup %2550  ;;  %v1805_v36 = vadd.f32 1.0, %v2549_v12 }
 0x64b   : > { %2554 = vrcp.f32 %v1792_v32  ;;  %v1806_v14 = vadd.f32 1.0, %v2551_v45 }
 0x64c   : > { %2556 = vrcp.f32 %v1805_v36 }
 0x64d   : > { %2558 = vrcp.f32 %v1806_v14 }
 0x654   : > { %v2553_v48 = vpop.eup %2552 }
 0x655   : > { %v2555_v40 = vpop.eup %2554  ;;  %v1811_v53 = vmul.f32 %v2553_v48, %v1708_v26 }
 0x656   : > { %v1812_v55 = vmul.f32 %v2555_v40, %v1708_v26  ;;  %v2557_v35 = vpop.eup %2556 }
 0x657   : > { %v1813_v56 = vadd.f32 %v1811_v53, %v3329_v9  ;;  %v2559_v58 = vpop.eup %2558  ;;  %v1817_v59 = vsub.f32 1.0, %v2557_v35  ;;  %v1821_v63 = vmul.f32 %v2557_v35, %v3314_v24 }
 0x658   : > { %v1814_v57 = vadd.f32 %v1812_v55, %v3331_v10  ;;  %v1818_v61 = vsub.f32 1.0, %v2559_v58  ;;  %v1822_v1 = vmul.f32 %v2559_v58, %v3314_v24 }
 0x659   : > { %2560 = vtanh.f32 %v1813_v56 }
 0x65a   : > { %2562 = vtanh.f32 %v1814_v57 }
 0x663   : > { %v2561_v60 = vpop.eup %2560 }
 0x664   : > { %v2563_v62 = vpop.eup %2562  ;;  %v1819_v19 = vmul.f32 %v2561_v60, %v1817_v59 }
 0x665   : > { %v1820_v0 = vmul.f32 %v2563_v62, %v1818_v61 }
 0x666   : > { %v1823_v2 = vadd.f32 %v1821_v63, %v1819_v19 }
 0x667   : > { %v1824_v3 = vadd.f32 %v1822_v1, %v1820_v0 }
 0x669   : > { %v1825_v4 = vpack.c.bf16 %v1824_v3, %v1823_v2 }
 0x66b   : > { %2387 = vmatmul.mubr.bf16.vlgmr.msra.gmra.mrb[32].mxu1 %v1825_v4 }
 0x73d   : > { %1929 = sbr.rel (!%p3498_p11) target bundleno = 1868 (0x74c), region = 110 }
 0x73e   : > { %v1914_v6 = vpop.f32.mrb[32].mxu1 }
 0x73f   : > { %v1915_v7 = vadd.f32 %v2130_v5, %v1914_v6  ;;  %v2388_v8 = vpop.f32.mrb[33].mxu1 }
 0x740   : > { %v1917_v9 = vpop.f32.mrb[34].mxu1 }
 0x741   : > { %1921 = vst.msk [vmem:[%s454_s24] sm:$0xff] %vm557_vm1, %v1915_v7  ;;  %v1918_v10 = vadd.f32 %v2130_v5, %v1917_v9  ;;  %v2389_v11 = vpop.f32.mrb[35].mxu1 }
 0x743   : > { %1922 = vst.msk [vmem:[%s454_s24 + $0x8] sm:$0xff] %vm557_vm1, %v1918_v10 }
 0x748   : > { %v1961_v24 = vld [vmem:[%s454_s24] sm:$0xff] }
 0x749   : > { %1962 = vst [vmem:[%s1931_s21] sm:$0xff] %v1961_v24 }
 0x74a   : > { %v1963_v39 = vld [vmem:[%s454_s24 + $0x8] sm:$0xff] }
 0x74b   : > { %1964 = vst [vmem:[%s1931_s21 + $0x10] sm:$0xff] %v1963_v39 }
 0x74c PF: > { %s3499_s19 = sld [smem:[#allocation8_spill]]  ;;  %s3500_s29 = sld [smem:[#allocation9_spill]] }
 0x74d   : > { %s3501_s17 = smov %s2614_s18 }
 0x752   : > { %p19_p13 = scmp.ge.s32.totalorder %s3499_s19, 4   ;;  %s3502_s18 = smov %s3500_s29 }
 0x754   :  { %21 = sbr.rel (!%p19_p13) target bundleno = 2 (0x2), region = 187 }
 0x75b   :  { %1980 = vsyncpa [#allocation5], 1 }
 0x75c   :  { %1982 = vsyncpa [#allocation5 + $0x1], 1 }

</bundles_post_ra>
